<compile_context>
chip_gen: v6e
topology: v6e:2x2x1
jax: 0.10.0
libtpu: 0.0.40
codegen_flags: <defaults>
</compile_context>

<pallas_src>
import math
import functools

import jax
import jax.numpy as jnp
from jax.experimental import pallas as pl
from jax.experimental.pallas import tpu as pltpu


def _round_up(x, m):
    return ((x + m - 1) // m) * m


def _is_single_tensorcore():
    # v5e / v6e ("lite" parts) expose one TensorCore per chip; v4 / v5p / v7x
    # expose two, so splitting the grid only pays off on the latter.
    try:
        kind = jax.devices()[0].device_kind.lower()
    except Exception:
        return True
    return ("lite" in kind) or ("v5e" in kind) or ("v6e" in kind)


def _pick_block_rows(bn, single_tc):
    # Bigger row blocks amortize the ~0.35us/step pipeline overhead.  On 1-TC
    # chips never split just to get >1 step; on 2-TC chips aim for >=4 steps
    # so both cores stay busy and still pipeline.  The in-kernel batched
    # 8x8x8 score/value matmuls unroll per row, so cap the block to keep code
    # size and compile time sane.
    target = 256 if single_tc else 128
    tb = min(target, _round_up(bn, 8))
    if (not single_tc) and bn >= 32:
        tb = min(tb, max(8, _round_up(pl.cdiv(bn, 4), 8)))
    return max(8, tb)


def _vmem_limit_bytes(tb, n_feat, d, n_heads, single_tc):
    lane, f32 = 128, 4
    x_blk = tb * n_feat * lane * f32            # lane-padded x block
    out_blk = tb * n_feat * d * f32             # dense out block
    mask_blk = tb * lane * f32
    w_bytes = d * 3 * d * 2 + 3 * d * f32
    inter = (tb * n_feat * lane * f32                       # qkv
             + 3 * n_heads * tb * n_feat * lane * 2         # bf16 q/k/v stacks
             + 3 * n_heads * tb * n_feat * lane * f32       # sim / p / attn
             + n_heads * tb * n_feat * lane * f32)          # out_s
    est = 2 * (x_blk + out_blk + mask_blk) + w_bytes + inter
    cap = (96 if single_tc else 48) * 1024 * 1024
    return int(min(max(est, 32 * 1024 * 1024), cap))


def _mha_kernel(x_ref, mask_ref, wqkv_ref, bqkv_ref, o_ref, *, n_heads, d_head):
    # x_ref:    (TB, F, D)  f32
    # mask_ref: (TB, F)     f32   (1.0 means "does not participate")
    # wqkv_ref: (D, 3D)     bf16  (Q columns pre-scaled by 1/sqrt(d_head))
    # bqkv_ref: (1, 3D)     f32
    # o_ref:    (TB, F*D)   f32   (lane-dense slab)
    TB, F, D = x_ref.shape
    H = n_heads

    # ---- fused QKV projection: one MXU matmul, bf16 operands, f32 acc ----
    x2d = x_ref[...].reshape(TB * F, D).astype(jnp.bfloat16)
    qkv = jnp.dot(x2d, wqkv_ref[...],
                  preferred_element_type=jnp.float32) + bqkv_ref[...]   # (TB*F, 3D)

    # ---- stack heads onto the batch axis (leading concat/reshape = free) ----
    def head_stack(base):
        parts = [qkv[:, base + h * d_head: base + (h + 1) * d_head]
                 for h in range(H)]
        return (jnp.concatenate(parts, axis=0)       # (H*TB*F, d_head)
                .reshape(H * TB, F, d_head)
                .astype(jnp.bfloat16))

    qs = head_stack(0 * D)   # Q already carries the 1/sqrt(d_head) scale
    ks = head_stack(1 * D)
    vs = head_stack(2 * D)

    # ---- mask bias, hoisted & built once per block ----
    bias = mask_ref[...][:, None, :] * jnp.float32(-1e10)       # (TB, 1, F)
    bias = jnp.concatenate([bias] * H, axis=0)                  # (H*TB, 1, F)

    # ---- attention: one fused op stream over the H*TB batch ----
    sim = jnp.einsum('bfd,bgd->bfg', qs, ks,
                     preferred_element_type=jnp.float32) + bias  # (H*TB, F, F)
    sim = sim - jnp.max(sim, axis=-1, keepdims=True)
    p = jnp.exp(sim)
    denom = jnp.sum(p, axis=-1, keepdims=True)
    attn = (p * pl.reciprocal(denom, approx=True)).astype(jnp.bfloat16)

    out_s = jnp.einsum('bfg,bgd->bfd', attn, vs,
                       preferred_element_type=jnp.float32)       # (H*TB, F, d_head)

    # ---- un-stack heads (leading-axis slices are free) ----
    out3 = jnp.concatenate([out_s[h * TB:(h + 1) * TB] for h in range(H)],
                           axis=-1)                              # (TB, F, D)

    # ---- write into the dense (TB, F*D) slab: dense VMEM buffer & DMA ----
    for f in range(F):
        o_ref[:, f * D:(f + 1) * D] = out3[:, f, :].astype(o_ref.dtype)


def multihead_attention(x, mask, params, *, n_heads):
    """x: (B, N, F, D) float32; mask: (B, N, F) float32 (1 = masked out)."""
    B, N, F, D = x.shape
    d_head = D // n_heads
    BN = B * N

    single_tc = _is_single_tensorcore()
    TB = _pick_block_rows(BN, single_tc)
    BN_pad = _round_up(BN, TB)

    x_f = x.reshape(BN, F, D)
    mask_f = mask.reshape(BN, F).astype(jnp.float32)
    if BN_pad != BN:
        pad = BN_pad - BN
        x_f = jnp.pad(x_f, ((0, pad), (0, 0), (0, 0)))
        mask_f = jnp.pad(mask_f, ((0, pad), (0, 0)))

    # Fuse QKV weights; fold 1/sqrt(d_head) into the Q columns; bf16 operands.
    scale = 1.0 / math.sqrt(d_head)
    wqkv = jnp.concatenate([params["wq"] * scale, params["wk"], params["wv"]],
                           axis=1).astype(jnp.bfloat16)          # (D, 3D)
    bqkv = jnp.concatenate([params["bq"] * scale, params["bk"], params["bv"]],
                           axis=1).astype(jnp.float32)           # (1, 3D)

    kernel = functools.partial(_mha_kernel, n_heads=n_heads, d_head=d_head)

    flops = (2 * BN_pad * F * D * (3 * D)                  # fused QKV matmul
             + 4 * BN_pad * n_heads * F * F * d_head)      # scores + attn@V
    cost = pl.CostEstimate(
        flops=int(flops),
        transcendentals=int(BN_pad * n_heads * F * F),
        bytes_accessed=int(2 * BN_pad * F * D * 4 + BN_pad * F * 4
                           + D * 3 * D * 2 + 3 * D * 4))

    out = pl.pallas_call(
        kernel,
        out_shape=jax.ShapeDtypeStruct((BN_pad, F * D), x.dtype),
        grid_spec=pltpu.PrefetchScalarGridSpec(
            num_scalar_prefetch=0,
            grid=(BN_pad // TB,),
            in_specs=[
                pl.BlockSpec((TB, F, D), lambda i: (i, 0, 0)),   # x rows
                pl.BlockSpec((TB, F), lambda i: (i, 0)),         # mask rows
                pl.BlockSpec((D, 3 * D), lambda i: (0, 0)),      # fused W_qkv
                pl.BlockSpec((1, 3 * D), lambda i: (0, 0)),      # fused b_qkv
            ],
            out_specs=pl.BlockSpec((TB, F * D), lambda i: (i, 0)),
        ),
        compiler_params=pltpu.CompilerParams(
            dimension_semantics=("parallel",),
            vmem_limit_bytes=_vmem_limit_bytes(TB, F, D, n_heads, single_tc)),
        cost_estimate=cost,
    )(x_f, mask_f, wqkv, bqkv)

    return out[:BN].reshape(B, N, F, D)


def reference(x, mask, params, *, n_heads):
    """Pure-JAX (f32) reference mirroring the PyTorch forward."""
    B, N, F, D = x.shape
    d_head = D // n_heads
    q = jnp.einsum("bnfd,de->bnfe", x, params["wq"]) + params["bq"][0]
    k = jnp.einsum("bnfd,de->bnfe", x, params["wk"]) + params["bk"][0]
    v = jnp.einsum("bnfd,de->bnfe", x, params["wv"]) + params["bv"][0]
    q = q.reshape(B, N, F, n_heads, d_head)
    k = k.reshape(B, N, F, n_heads, d_head)
    v = v.reshape(B, N, F, n_heads, d_head).transpose(0, 1, 3, 2, 4)  # b n h f d
    sim = jnp.einsum("bnfhd,bnghd->bnhfg", q, k) / math.sqrt(d_head)
    sim = sim + mask[:, :, None, None, :] * -10000000000.0
    attn = jax.nn.softmax(sim, axis=-1)
    out = jnp.einsum("bnhfg,bnhgd->bnhfd", attn, v)
    out = out.transpose(0, 1, 3, 2, 4).reshape(B, N, F, D)
    return out


if __name__ == "__main__":
    key = jax.random.PRNGKey(0)
    B, N, F, D = 2, 3, 8, 32
    n_heads = 4
    # dropout = 0.0 -> self.dropout is None in the PyTorch module; nothing to do.

    k1, k2, k3, k4, k5, k6, k7, k8 = jax.random.split(key, 8)
    scale = 1.0 / math.sqrt(D)
    params = {
        "wq": jax.random.uniform(k1, (D, D), jnp.float32, -scale, scale),
        "wk": jax.random.uniform(k2, (D, D), jnp.float32, -scale, scale),
        "wv": jax.random.uniform(k3, (D, D), jnp.float32, -scale, scale),
        "bq": jax.random.uniform(k4, (1, D), jnp.float32, -scale, scale),
        "bk": jax.random.uniform(k5, (1, D), jnp.float32, -scale, scale),
        "bv": jax.random.uniform(k6, (1, D), jnp.float32, -scale, scale),
    }

    x = jax.random.normal(k7, (B, N, F, D), jnp.float32)
    mask = (jax.random.uniform(k8, (B, N, F)) < 0.25).astype(jnp.float32)
    # Make sure at least one token per row participates.
    mask = mask.at[:, :, 0].set(0.0)

    out = multihead_attention(x, mask, params, n_heads=n_heads)
    out = jax.block_until_ready(out)

    ref = reference(x, mask, params, n_heads=n_heads)
    # Tolerance covers bf16 MXU operands (f32 accumulation) and the approx
    # (EUP) reciprocal in the softmax normalization.
    assert jnp.allclose(out, ref, atol=2e-2, rtol=2e-2), "mismatch vs reference"

    print("KERNEL_OK")
</pallas_src>

<mosaic_0001>
module attributes {stable_mosaic.version = 11 : i64} {
  func.func @_mha_kernel(%arg0: i32, %arg1: memref<8x8x32xf32, #tpu.memory_space<vmem>>, %arg2: memref<8x8xf32, #tpu.memory_space<vmem>>, %arg3: memref<32x96xbf16, #tpu.memory_space<vmem>>, %arg4: memref<1x96xf32, #tpu.memory_space<vmem>>, %arg5: memref<8x256xf32, #tpu.memory_space<vmem>>) attributes {dimension_semantics = [#tpu.dimension_semantics<parallel>], iteration_bounds = array<i64: 1>, scalar_prefetch = 0 : i64, scratch_operands = 0 : i64, tpu.core_type = #tpu.core_type<tc>, window_params = [{transform_indices = @transform_0, window_bounds = array<i64: 8, 8, 32>}, {transform_indices = @transform_1, window_bounds = array<i64: 8, 8>}, {pipeline_mode = #tpu.pipeline_mode<synchronous>, transform_indices = @transform_2, window_bounds = array<i64: 32, 96>}, {pipeline_mode = #tpu.pipeline_mode<synchronous>, transform_indices = @transform_3, window_bounds = array<i64: 1, 96>}, {transform_indices = @transform_4, window_bounds = array<i64: 8, 256>}]} {
    %c0 = arith.constant 0 : index
    %c0_0 = arith.constant 0 : index
    %c0_1 = arith.constant 0 : index
    %0 = vector.load %arg1[%c0, %c0_0, %c0_1] : memref<8x8x32xf32, #tpu.memory_space<vmem>>, vector<8x8x32xf32>
    %1 = vector.shape_cast %0 : vector<8x8x32xf32> to vector<64x32xf32>
    %2 = arith.truncf %1 : vector<64x32xf32> to vector<64x32xbf16>
    %c0_2 = arith.constant 0 : index
    %c0_3 = arith.constant 0 : index
    %3 = vector.load %arg3[%c0_2, %c0_3] : memref<32x96xbf16, #tpu.memory_space<vmem>>, vector<32x96xbf16>
    %cst = arith.constant dense<0.000000e+00> : vector<64x96xf32>
    %4 = tpu.matmul %2, %3, %cst {dimension_numbers = #tpu.dot_dimension_numbers<[1], [0], [0], [1], [0, 0, 1, 1], [], []>} : vector<64x32xbf16>, vector<32x96xbf16>, vector<64x96xf32> -> vector<64x96xf32>
    %c0_4 = arith.constant 0 : index
    %c0_5 = arith.constant 0 : index
    %5 = vector.load %arg4[%c0_4, %c0_5] : memref<1x96xf32, #tpu.memory_space<vmem>>, vector<1x96xf32>
    %6 = vector.broadcast %5 : vector<1x96xf32> to vector<64x96xf32>
    %7 = arith.addf %4, %6 : vector<64x96xf32>
    %8 = vector.extract_strided_slice %7 {offsets = [0, 0], sizes = [64, 8], strides = [1, 1]} : vector<64x96xf32> to vector<64x8xf32>
    %9 = vector.extract_strided_slice %7 {offsets = [0, 8], sizes = [64, 8], strides = [1, 1]} : vector<64x96xf32> to vector<64x8xf32>
    %10 = vector.extract_strided_slice %7 {offsets = [0, 16], sizes = [64, 8], strides = [1, 1]} : vector<64x96xf32> to vector<64x8xf32>
    %11 = vector.extract_strided_slice %7 {offsets = [0, 24], sizes = [64, 8], strides = [1, 1]} : vector<64x96xf32> to vector<64x8xf32>
    %12 = tpu.concatenate %8, %9, %10, %11 in 0 : vector<64x8xf32>, vector<64x8xf32>, vector<64x8xf32>, vector<64x8xf32> -> vector<256x8xf32>
    %13 = vector.shape_cast %12 : vector<256x8xf32> to vector<32x8x8xf32>
    %14 = arith.truncf %13 : vector<32x8x8xf32> to vector<32x8x8xbf16>
    %15 = vector.extract_strided_slice %7 {offsets = [0, 32], sizes = [64, 8], strides = [1, 1]} : vector<64x96xf32> to vector<64x8xf32>
    %16 = vector.extract_strided_slice %7 {offsets = [0, 40], sizes = [64, 8], strides = [1, 1]} : vector<64x96xf32> to vector<64x8xf32>
    %17 = vector.extract_strided_slice %7 {offsets = [0, 48], sizes = [64, 8], strides = [1, 1]} : vector<64x96xf32> to vector<64x8xf32>
    %18 = vector.extract_strided_slice %7 {offsets = [0, 56], sizes = [64, 8], strides = [1, 1]} : vector<64x96xf32> to vector<64x8xf32>
    %19 = tpu.concatenate %15, %16, %17, %18 in 0 : vector<64x8xf32>, vector<64x8xf32>, vector<64x8xf32>, vector<64x8xf32> -> vector<256x8xf32>
    %20 = vector.shape_cast %19 : vector<256x8xf32> to vector<32x8x8xf32>
    %21 = arith.truncf %20 : vector<32x8x8xf32> to vector<32x8x8xbf16>
    %22 = vector.extract_strided_slice %7 {offsets = [0, 64], sizes = [64, 8], strides = [1, 1]} : vector<64x96xf32> to vector<64x8xf32>
    %23 = vector.extract_strided_slice %7 {offsets = [0, 72], sizes = [64, 8], strides = [1, 1]} : vector<64x96xf32> to vector<64x8xf32>
    %24 = vector.extract_strided_slice %7 {offsets = [0, 80], sizes = [64, 8], strides = [1, 1]} : vector<64x96xf32> to vector<64x8xf32>
    %25 = vector.extract_strided_slice %7 {offsets = [0, 88], sizes = [64, 8], strides = [1, 1]} : vector<64x96xf32> to vector<64x8xf32>
    %26 = tpu.concatenate %22, %23, %24, %25 in 0 : vector<64x8xf32>, vector<64x8xf32>, vector<64x8xf32>, vector<64x8xf32> -> vector<256x8xf32>
    %27 = vector.shape_cast %26 : vector<256x8xf32> to vector<32x8x8xf32>
    %28 = arith.truncf %27 : vector<32x8x8xf32> to vector<32x8x8xbf16>
    %c0_6 = arith.constant 0 : index
    %c0_7 = arith.constant 0 : index
    %29 = vector.load %arg2[%c0_6, %c0_7] : memref<8x8xf32, #tpu.memory_space<vmem>>, vector<8x8xf32>
    %30 = vector.shape_cast %29 : vector<8x8xf32> to vector<8x1x8xf32>
    %cst_8 = arith.constant -1.000000e+10 : f32
    %31 = vector.broadcast %cst_8 : f32 to vector<8x1x8xf32>
    %32 = arith.mulf %30, %31 : vector<8x1x8xf32>
    %33 = tpu.concatenate %32, %32, %32, %32 in 0 : vector<8x1x8xf32>, vector<8x1x8xf32>, vector<8x1x8xf32>, vector<8x1x8xf32> -> vector<32x1x8xf32>
    "tpu.trace_start"() <{level = 10 : i32, message = "bfd,bgd->bfg"}> : () -> ()
    %cst_9 = arith.constant dense<0.000000e+00> : vector<32x8x8xf32>
    %34 = tpu.matmul %14, %21, %cst_9 {dimension_numbers = #tpu.dot_dimension_numbers<[2], [2], [1], [1], [0, 0, 0, 1, 1, 1], [0], [0]>} : vector<32x8x8xbf16>, vector<32x8x8xbf16>, vector<32x8x8xf32> -> vector<32x8x8xf32>
    "tpu.trace_stop"() : () -> ()
    %35 = vector.broadcast %33 : vector<32x1x8xf32> to vector<32x8x8xf32>
    %36 = arith.addf %34, %35 : vector<32x8x8xf32>
    %cst_10 = arith.constant dense<0xFF800000> : vector<32x8xf32>
    %37 = vector.multi_reduction <maximumf>, %36, %cst_10 [2] : vector<32x8x8xf32> to vector<32x8xf32>
    %38 = vector.shape_cast %37 : vector<32x8xf32> to vector<32x8x1xf32>
    %39 = vector.broadcast %38 : vector<32x8x1xf32> to vector<32x8x8xf32>
    %40 = arith.subf %36, %39 : vector<32x8x8xf32>
    %41 = math.exp %40 : vector<32x8x8xf32>
    %cst_11 = arith.constant dense<0.000000e+00> : vector<32x8xf32>
    %42 = vector.multi_reduction <add>, %41, %cst_11 [2] : vector<32x8x8xf32> to vector<32x8xf32>
    %43 = vector.shape_cast %42 : vector<32x8xf32> to vector<32x8x1xf32>
    %44 = tpu.reciprocal %43 {approx = true} : vector<32x8x1xf32> -> vector<32x8x1xf32>
    %45 = vector.broadcast %44 : vector<32x8x1xf32> to vector<32x8x8xf32>
    %46 = arith.mulf %41, %45 : vector<32x8x8xf32>
    %47 = arith.truncf %46 : vector<32x8x8xf32> to vector<32x8x8xbf16>
    "tpu.trace_start"() <{level = 10 : i32, message = "bfg,bgd->bfd"}> : () -> ()
    %cst_12 = arith.constant dense<0.000000e+00> : vector<32x8x8xf32>
    %48 = tpu.matmul %47, %28, %cst_12 {dimension_numbers = #tpu.dot_dimension_numbers<[2], [1], [1], [2], [0, 0, 0, 1, 1, 2], [0], [0]>} : vector<32x8x8xbf16>, vector<32x8x8xbf16>, vector<32x8x8xf32> -> vector<32x8x8xf32>
    "tpu.trace_stop"() : () -> ()
    %49 = vector.extract_strided_slice %48 {offsets = [0, 0, 0], sizes = [8, 8, 8], strides = [1, 1, 1]} : vector<32x8x8xf32> to vector<8x8x8xf32>
    %50 = vector.extract_strided_slice %48 {offsets = [8, 0, 0], sizes = [8, 8, 8], strides = [1, 1, 1]} : vector<32x8x8xf32> to vector<8x8x8xf32>
    %51 = vector.extract_strided_slice %48 {offsets = [16, 0, 0], sizes = [8, 8, 8], strides = [1, 1, 1]} : vector<32x8x8xf32> to vector<8x8x8xf32>
    %52 = vector.extract_strided_slice %48 {offsets = [24, 0, 0], sizes = [8, 8, 8], strides = [1, 1, 1]} : vector<32x8x8xf32> to vector<8x8x8xf32>
    %53 = tpu.concatenate %49, %50, %51, %52 in 2 : vector<8x8x8xf32>, vector<8x8x8xf32>, vector<8x8x8xf32>, vector<8x8x8xf32> -> vector<8x8x32xf32>
    %54 = vector.extract_strided_slice %53 {offsets = [0, 0, 0], sizes = [8, 1, 32], strides = [1, 1, 1]} : vector<8x8x32xf32> to vector<8x1x32xf32>
    %55 = vector.shape_cast %54 : vector<8x1x32xf32> to vector<8x32xf32>
    %c0_13 = arith.constant 0 : index
    %c0_14 = arith.constant 0 : index
    %56 = vector.load %arg5[%c0_13, %c0_14] : memref<8x256xf32, #tpu.memory_space<vmem>>, vector<8x32xf32>
    tpu.vector_store %arg5[%c0_13, %c0_14], %55 {strides = array<i32>} : memref<8x256xf32, #tpu.memory_space<vmem>>, vector<8x32xf32>,
    %57 = vector.extract_strided_slice %53 {offsets = [0, 1, 0], sizes = [8, 1, 32], strides = [1, 1, 1]} : vector<8x8x32xf32> to vector<8x1x32xf32>
    %58 = vector.shape_cast %57 : vector<8x1x32xf32> to vector<8x32xf32>
    %c0_15 = arith.constant 0 : index
    %c32 = arith.constant 32 : index
    %59 = vector.load %arg5[%c0_15, %c32] : memref<8x256xf32, #tpu.memory_space<vmem>>, vector<8x32xf32>
    tpu.vector_store %arg5[%c0_15, %c32], %58 {strides = array<i32>} : memref<8x256xf32, #tpu.memory_space<vmem>>, vector<8x32xf32>,
    %60 = vector.extract_strided_slice %53 {offsets = [0, 2, 0], sizes = [8, 1, 32], strides = [1, 1, 1]} : vector<8x8x32xf32> to vector<8x1x32xf32>
    %61 = vector.shape_cast %60 : vector<8x1x32xf32> to vector<8x32xf32>
    %c0_16 = arith.constant 0 : index
    %c64 = arith.constant 64 : index
    %62 = vector.load %arg5[%c0_16, %c64] : memref<8x256xf32, #tpu.memory_space<vmem>>, vector<8x32xf32>
    tpu.vector_store %arg5[%c0_16, %c64], %61 {strides = array<i32>} : memref<8x256xf32, #tpu.memory_space<vmem>>, vector<8x32xf32>,
    %63 = vector.extract_strided_slice %53 {offsets = [0, 3, 0], sizes = [8, 1, 32], strides = [1, 1, 1]} : vector<8x8x32xf32> to vector<8x1x32xf32>
    %64 = vector.shape_cast %63 : vector<8x1x32xf32> to vector<8x32xf32>
    %c0_17 = arith.constant 0 : index
    %c96 = arith.constant 96 : index
    %65 = vector.load %arg5[%c0_17, %c96] : memref<8x256xf32, #tpu.memory_space<vmem>>, vector<8x32xf32>
    tpu.vector_store %arg5[%c0_17, %c96], %64 {strides = array<i32>} : memref<8x256xf32, #tpu.memory_space<vmem>>, vector<8x32xf32>,
    %66 = vector.extract_strided_slice %53 {offsets = [0, 4, 0], sizes = [8, 1, 32], strides = [1, 1, 1]} : vector<8x8x32xf32> to vector<8x1x32xf32>
    %67 = vector.shape_cast %66 : vector<8x1x32xf32> to vector<8x32xf32>
    %c0_18 = arith.constant 0 : index
    %c128 = arith.constant 128 : index
    %68 = vector.load %arg5[%c0_18, %c128] : memref<8x256xf32, #tpu.memory_space<vmem>>, vector<8x32xf32>
    tpu.vector_store %arg5[%c0_18, %c128], %67 {strides = array<i32>} : memref<8x256xf32, #tpu.memory_space<vmem>>, vector<8x32xf32>,
    %69 = vector.extract_strided_slice %53 {offsets = [0, 5, 0], sizes = [8, 1, 32], strides = [1, 1, 1]} : vector<8x8x32xf32> to vector<8x1x32xf32>
    %70 = vector.shape_cast %69 : vector<8x1x32xf32> to vector<8x32xf32>
    %c0_19 = arith.constant 0 : index
    %c160 = arith.constant 160 : index
    %71 = vector.load %arg5[%c0_19, %c160] : memref<8x256xf32, #tpu.memory_space<vmem>>, vector<8x32xf32>
    tpu.vector_store %arg5[%c0_19, %c160], %70 {strides = array<i32>} : memref<8x256xf32, #tpu.memory_space<vmem>>, vector<8x32xf32>,
    %72 = vector.extract_strided_slice %53 {offsets = [0, 6, 0], sizes = [8, 1, 32], strides = [1, 1, 1]} : vector<8x8x32xf32> to vector<8x1x32xf32>
    %73 = vector.shape_cast %72 : vector<8x1x32xf32> to vector<8x32xf32>
    %c0_20 = arith.constant 0 : index
    %c192 = arith.constant 192 : index
    %74 = vector.load %arg5[%c0_20, %c192] : memref<8x256xf32, #tpu.memory_space<vmem>>, vector<8x32xf32>
    tpu.vector_store %arg5[%c0_20, %c192], %73 {strides = array<i32>} : memref<8x256xf32, #tpu.memory_space<vmem>>, vector<8x32xf32>,
    %75 = vector.extract_strided_slice %53 {offsets = [0, 7, 0], sizes = [8, 1, 32], strides = [1, 1, 1]} : vector<8x8x32xf32> to vector<8x1x32xf32>
    %76 = vector.shape_cast %75 : vector<8x1x32xf32> to vector<8x32xf32>
    %c0_21 = arith.constant 0 : index
    %c224 = arith.constant 224 : index
    %77 = vector.load %arg5[%c0_21, %c224] : memref<8x256xf32, #tpu.memory_space<vmem>>, vector<8x32xf32>
    tpu.vector_store %arg5[%c0_21, %c224], %76 {strides = array<i32>} : memref<8x256xf32, #tpu.memory_space<vmem>>, vector<8x32xf32>,
    return
  }
  func.func @transform_0(%arg0: i32) -> (i32, i32, i32) {
    %c0_i32 = arith.constant 0 : i32
    %c0_i32_0 = arith.constant 0 : i32
    %c0_i32_1 = arith.constant 0 : i32
    return %arg0, %c0_i32, %c0_i32_0 : i32, i32, i32
  }
  func.func @transform_1(%arg0: i32) -> (i32, i32) {
    %c0_i32 = arith.constant 0 : i32
    %c0_i32_0 = arith.constant 0 : i32
    return %arg0, %c0_i32 : i32, i32
  }
  func.func @transform_2(%arg0: i32) -> (i32, i32) {
    %c0_i32 = arith.constant 0 : i32
    %c0_i32_0 = arith.constant 0 : i32
    %c0_i32_1 = arith.constant 0 : i32
    return %c0_i32, %c0_i32_0 : i32, i32
  }
  func.func @transform_3(%arg0: i32) -> (i32, i32) {
    %c0_i32 = arith.constant 0 : i32
    %c0_i32_0 = arith.constant 0 : i32
    %c0_i32_1 = arith.constant 0 : i32
    return %c0_i32, %c0_i32_0 : i32, i32
  }
  func.func @transform_4(%arg0: i32) -> (i32, i32) {
    %c0_i32 = arith.constant 0 : i32
    %c0_i32_0 = arith.constant 0 : i32
    return %arg0, %c0_i32 : i32, i32
  }
}

</mosaic_0001>

<bundles_post_ra>
// kernel: tpu_custom_call.1
= control target key start
LH: loop header
LB: loop body
LE: loop exit
PB: predicated region body
PF: predicated region fallthrough
CT: control target
= control target key end

     0   :  { %9 = vsyncpa [#allocation3], 0  ;;  %s6320_s0 = inlined_call_operand.hbm [shape: f32[8,8,32], index: 0, kind: input, shape index: {}]   ;;  %s6321_s1 = inlined_call_operand.hbm [shape: f32[8,8], index: 1, kind: input, shape index: {}]   ;;  %s6322_s2 = inlined_call_operand.hbm [shape: bf16[32,96], index: 2, kind: input, shape index: {}]   ;;  %s6323_s3 = inlined_call_operand.vmem [shape: f32[1,96], index: 3, kind: input, shape index: {}]   ;;  %s6324_s4 = inlined_call_operand.hbm [shape: f32[8,256], index: 4, kind: output, shape index: {}]  }
   0x1   :  { %10 = vsyncpa [#allocation6], 0 }
   0x2   :  { %11 = vsyncpa [#allocation4], 0  ;;  %s5080_s15 = smov [#allocation5]   ;;  %s5081_s17 = smov [#allocation2]  }
   0x3   :  { %s30_s16 = sshll.u32 %s5080_s15, 4  ;;  %s17_s18 = sshll.u32 %s5081_s17, 4  ;;  %s31_s16 = int_to_ptr.vmem [resolvable:$true] %s30_s16  ;;  %s18_s18 = int_to_ptr.vmem [resolvable:$true] %s17_s18 }
   0x4   :  { %s5002_s19 = scalar_lea.vmem %s31_s16, 128  ;;  %p5007_p1 = scmp.lt.s32.totalorder %s31_s16, %s31_s16 }
   0x5   :  { %p5003_p0 = scmp.ne.s32.totalorder %s31_s16, %s5002_s19  ;;  %p5008_p2 = scmp.lt.s32.totalorder %s5002_s19, %s5002_s19 }
   0x7   :  { %p5009_p3 = por %p5008_p2, %p5007_p1 }
   0x9   :  { %p5010_p4 = pnand %p5009_p3, %p5003_p0 }
   0xb   :  { %5013 = shalt.err (!%p5010_p4)
}
   0xc   :  { %33 = dma.hbm_to_vmem [thread:$0]  %s6321_s1, 128, %s31_s16, [#allocation6]  }
   0xd   :  { %s5022_s22 = scalar_lea.vmem %s18_s18, 1024  ;;  %p5027_p6 = scmp.lt.s32.totalorder %s18_s18, %s18_s18 }
   0xe   :  { %p5023_p5 = scmp.ne.s32.totalorder %s18_s18, %s5022_s22  ;;  %p5028_p7 = scmp.lt.s32.totalorder %s5022_s22, %s5022_s22 }
  0x10   :  { %p5029_p8 = por %p5028_p7, %p5027_p6 }
  0x12   :  { %p5030_p9 = pnand %p5029_p8, %p5023_p5 }
  0x14   :  { %5033 = shalt.err (!%p5030_p9)
}
  0x15   :  { %s5082_s23 = smov 128   ;;  %s5083_s24 = smov 8  }
  0x16   :  { %23 = dma.hbm_to_vmem [thread:$0]  %s6320_s0, 1024, %s18_s18, [#allocation3], %s5082_s23, %s5082_s23, %s5083_s24  }
  0x17   :  { %s5084_s27 = smov [#allocation7]  }
  0x18   :  { %s39_s28 = sshll.u32 %s5084_s27, 4  ;;  %s40_s28 = int_to_ptr.vmem [resolvable:$true] %s39_s28 }
  0x19   :  { %s5042_s29 = scalar_lea.vmem %s40_s28, 256  ;;  %p5047_p11 = scmp.lt.s32.totalorder %s40_s28, %s40_s28 }
  0x1a   :  { %p5043_p10 = scmp.ne.s32.totalorder %s40_s28, %s5042_s29  ;;  %p5048_p12 = scmp.lt.s32.totalorder %s5042_s29, %s5042_s29 }
  0x1c   :  { %p5049_p13 = por %p5048_p12, %p5047_p11 }
  0x1e   :  { %p5050_p0 = pnand %p5049_p13, %p5043_p10 }
  0x20   :  { %5053 = shalt.err (!%p5050_p0)
}
  0x21   :  { %s5085_s1 = smov 64   ;;  %s5086_s30 = smov 4  }
  0x22   :  { %45 = dma.hbm_to_vmem [thread:$0]  %s6322_s2, 256, %s40_s28, [#allocation6], %s5085_s1, %s5085_s1, %s5086_s30  }
  0x23   :  { %5074 = dma.done.wait [#allocation3], 1024  }
  0x24   :  { %5075 = vsyncadd [#allocation3], 4294966272 }
  0x25   :  { %5076 = dma.done.wait [#allocation6], 384  }
  0x26   :  { %5077 = vsyncadd [#allocation6], 4294966912  ;;  %v4863_v0 = vld [vmem:[#allocation7 + $0x8] sm:$0xff]   ;;  %v4864_v1 = vld [vmem:[#allocation7] sm:$0xff]   ;;  %vm93_vm0 = vcmask 261120   ;;  %s5087_s7 = smov 120  }
  0x27   :  { %4389 = vmatprep.subr.bf16.mxu0 %v4863_v0  ;;  %v58_v2 = vld [vmem:[#allocation2] sm:$0xff]  ;;  %v59_v3 = vld [vmem:[#allocation2 + $0x8] sm:$0xff]  ;;  %v60_v5 = vld [vmem:[#allocation2 + $0x10] sm:$0xff]  ;;  %v6325_v28 = vmov 0.0   ;;  %vm5089_vm1 = vmmov 0   ;;  %s5091_s8 = smov 96  }
  0x28   :  { %4390 = vmatpush3.bf16.msra.mxu0 %v4863_v0  ;;  %v66_v4 = vpack.c.bf16 %v59_v3, %v58_v2  ;;  %v61_v6 = vld [vmem:[#allocation2 + $0x18] sm:$0xff]  ;;  %v62_v7 = vld [vmem:[#allocation2 + $0x20] sm:$0xff]  ;;  %v63_v8 = vld [vmem:[#allocation2 + $0x28] sm:$0xff]  ;;  %4401 = vmatprep.subr.bf16.mxu1 %v6325_v28  ;;  %s5092_s9 = smov 104   ;;  %vm401_vm2 = vcmask 64512   ;;  %vm2356_vm3 = vcmask 1043456  }
  0x29   :  { %4391 = vmatprep.subr.bf16.mxu0 %v4864_v1  ;;  %v67_v9 = vpack.c.bf16 %v61_v6, %v60_v5  ;;  %v68_v10 = vpack.c.bf16 %v63_v8, %v62_v7  ;;  %v64_v11 = vld [vmem:[#allocation2 + $0x30] sm:$0xff]  ;;  %v65_v12 = vld [vmem:[#allocation2 + $0x38] sm:$0xff]  ;;  %v4184_v16 = vld [vmem:[%s6323_s3] ss:$0 sm:$0xff]  ;;  %4403 = vmatprep.mubr.msk.bf16.mxu1 %vm5089_vm1, %v6325_v28  ;;  %s5090_s3 = smov 112   ;;  %s5094_s10 = smov 16  }
  0x2a   :  { %4393 = vmatprep.mubr.msk.bf16.mxu0 %vm93_vm0, %v66_v4  ;;  %v69_v13 = vpack.c.bf16 %v65_v12, %v64_v11  ;;  %s5095_s11 = smov 24   ;;  %vm3992_vm4 = vcmask 130048   ;;  %vm4001_vm5 = vcmask 195584   ;;  %vm4019_vm6 = vcmask 1041409   ;;  %s5096_s12 = smov 32  }
  0x2b   :  { %vm4022_vm7 = vcmask 1042434   ;;  %vm4025_vm8 = vcmask 1043459   ;;  %vm4028_vm9 = vcmask 1044484   ;;  %vm4031_vm10 = vcmask 1045509   ;;  %s5097_s13 = smov [#allocation8]  }
  0x2c   :  { %4392 = vmatpush3.bf16.msra.mxu0 %v4864_v1  ;;  %vm4034_vm11 = vcmask 1046534   ;;  %vm4037_vm12 = vcmask 1047559   ;;  %vm4058_vm13 = vcmask 523520   ;;  %vm4077_vm14 = vcmask 785920   ;;  %s4174_s14 = sshll.u32 %s5097_s13, 4  ;;  %s4175_s14 = int_to_ptr.vmem [resolvable:$true] %s4174_s14 }
  0x2d   :  { %4413 = vmatprep.subr.bf16.mxu0 %v6325_v28  ;;  %vm4096_vm15 = vcmask 1048320   ;;  %s5054_s15 = scalar_lea.vmem %s4175_s14, 256  ;;  %p5059_p2 = scmp.lt.s32.totalorder %s4175_s14, %s4175_s14 }
  0x2e   :  { %p5055_p1 = scmp.ne.s32.totalorder %s4175_s14, %s5054_s15  ;;  %p5060_p3 = scmp.lt.s32.totalorder %s5054_s15, %s5054_s15 }
  0x2f   :  { %4394 = vmatmul.mubr.msk.bf16.vlgmr.msra.gmra.mxu0 %vm93_vm0, %v67_v9 }
  0x30   :  { %4397 = vmatprep.mubr.msk.bf16.mxu0 %vm93_vm0, %v68_v10  ;;  %p5061_p4 = por %p5060_p3, %p5059_p2 }
  0x32   :  { %p5062_p5 = pnand %p5061_p4, %p5055_p1 }
  0x37   :  { %4398 = vmatmul.mubr.msk.bf16.gmra.mxu0 %vm93_vm0, %v69_v13 }
  0x38   :  { %4415 = vmatprep.mubr.msk.bf16.mxu0 %vm5089_vm1, %v6325_v28 }
  0xef   :  { %v4395_v14 = vpop.f32.mrf.mxu0 }
  0xf0   :  { %v149_v19 = vadd.f32 %v4395_v14, %v4184_v16 }
  0xf1   :  { %v140_v15 = vpop.f32.mrf.mxu0 }
  0xf2   :  { %v141_v21 = vadd.f32 %v4184_v16, %v140_v15  ;;  %v5171_v40 = vpack.c.bf16 %v149_v19, %v149_v19 }
  0xf3   :  { %v4396_v17 = vpop.f32.mrf.mxu0 }
  0xf4   :  { %v152_v18 = vadd.f32 %v4396_v17, %v4184_v16  ;;  %v5157_v36 = vpack.c.bf16 %v141_v21, %v141_v21 }
  0xf5   :  { %v143_v20 = vpop.f32.mrf.mxu0 }
  0xf6   :  { %v144_v22 = vadd.f32 %v4184_v16, %v143_v20  ;;  %v5142_v24 = vpack.i.bf16 %v152_v18, %v149_v19  ;;  %v5161_v37 = vpack.c.bf16 %v152_v18, %v152_v18 }
  0xf7   :  { %v4399_v23 = vpop.f32.mrf.mxu0 }
  0xf8   :  { %v4803_v25 = vpack.i.bf16 %v144_v22, %v141_v21  ;;  %v165_v27 = vadd.f32 %v4399_v23, %v4184_v16  ;;  %v5163_v38 = vpack.c.bf16 %v144_v22, %v144_v22 }
  0xf9   :  { %v156_v26 = vpop.f32.mrf.mxu0 }
  0xfa   :  { %4804 = vrot.lane.b32.xlu0 %v4803_v25, %s5087_s7  ;;  %v157_v30 = vadd.f32 %v4184_v16, %v156_v26  ;;  %v5187_v43 = vpack.c.bf16 %v165_v27, %v165_v27 }
  0xfb   :  { %v4400_v29 = vpop.f32.mrf.mxu0 }
  0xfc   :  { %v168_v31 = vadd.f32 %v4400_v29, %v4184_v16  ;;  %v5169_v39 = vpack.c.bf16 %v157_v30, %v157_v30 }
  0xfd   :  { %v159_v32 = vpop.f32.mrf.mxu0 }
  0xfe   :  { %v160_v33 = vadd.f32 %v4184_v16, %v159_v32  ;;  %4809 = vrot.lane.b32.xlu0 %v5142_v24, %s5087_s7  ;;  %v5147_v34 = vpack.i.bf16 %v168_v31, %v165_v27  ;;  %v5179_v41 = vpack.c.bf16 %v168_v31, %v168_v31 }
 0x100   :  { %v5153_v35 = vpack.i.bf16 %v160_v33, %v157_v30  ;;  %v5181_v42 = vpack.c.bf16 %v160_v33, %v160_v33 }
 0x102   :  { %4814 = vrot.lane.b32.xlu1 %v5153_v35, %s5087_s7  ;;  %4819 = vrot.lane.b32.xlu0 %v5147_v34, %s5087_s7 }
 0x106   :  { %4824 = vrot.lane.b32.xlu0 %v4803_v25, %s5090_s3  ;;  %399 = vrot.lane.b32.xlu1 %v5157_v36, %s5091_s8 }
 0x10a   :  { %547 = vrot.lane.b32.xlu0 %v5161_v37, %s5091_s8  ;;  %449 = vrot.lane.b32.xlu1 %v5163_v38, %s5091_s8 }
 0x10e   :  { %596 = vrot.lane.b32.xlu0 %v5169_v39, %s5091_s8  ;;  %498 = vrot.lane.b32.xlu1 %v5171_v40, %s5091_s8 }
 0x112   :  { %4834 = vrot.lane.b32.xlu0 %v5153_v35, %s5090_s3  ;;  %4829 = vrot.lane.b32.xlu1 %v5142_v24, %s5090_s3 }
 0x116   :  { %743 = vrot.lane.b32.xlu0 %v5179_v41, %s5091_s8  ;;  %645 = vrot.lane.b32.xlu1 %v5181_v42, %s5091_s8 }
 0x11a   :  { %694 = vrot.lane.b32.xlu1 %v5187_v43, %s5091_s8 }
 0x11e   :  { %4839 = vrot.lane.b32.xlu1 %v5147_v34, %s5090_s3 }
 0x16c   :  { %v4805_v44 = vpop.permute.xlu0 %4804 }
 0x16d   :  { %v4807_v45 = vunpack.i.h.bf16 %v4805_v44  ;;  %v4806_v46 = vunpack.i.l.bf16 %v4805_v44 }
 0x16f   :  { %v5192_v47 = vpack.c.bf16 %v4806_v46, %v4806_v46  ;;  %v5194_v48 = vpack.c.bf16 %v4807_v45, %v4807_v45 }
 0x170   :  { %v4810_v49 = vpop.permute.xlu0 %4809 }
 0x171   :  { %v4811_v50 = vunpack.i.l.bf16 %v4810_v49  ;;  %792 = vrot.lane.b32.xlu0 %v5192_v47, %s5091_s8  ;;  %841 = vrot.lane.b32.xlu1 %v5194_v48, %s5091_s8  ;;  %v4812_v51 = vunpack.i.h.bf16 %v4810_v49 }
 0x173   :  { %v5200_v52 = vpack.c.bf16 %v4811_v50, %v4811_v50  ;;  %v5205_v57 = vpack.c.bf16 %v4812_v51, %v4812_v51 }
 0x174   :  { %v4815_v53 = vpop.permute.xlu1 %4814  ;;  %v4820_v54 = vpop.permute.xlu0 %4819 }
 0x175   :  { %v4817_v55 = vunpack.i.h.bf16 %v4815_v53  ;;  %v4816_v56 = vunpack.i.l.bf16 %v4815_v53  ;;  %4844 = vrot.lane.b32.xlu0 %v4803_v25, %s5092_s9  ;;  %890 = vrot.lane.b32.xlu1 %v5200_v52, %s5091_s8  ;;  %v4821_v60 = vunpack.i.l.bf16 %v4820_v54  ;;  %v4822_v2 = vunpack.i.h.bf16 %v4820_v54 }
 0x177   :  { %v5212_v62 = vpack.c.bf16 %v4816_v56, %v4816_v56  ;;  %v5214_v63 = vpack.c.bf16 %v4817_v55, %v4817_v55  ;;  %v5221_v3 = vpack.c.bf16 %v4821_v60, %v4821_v60  ;;  %v5228_v6 = vpack.c.bf16 %v4822_v2, %v4822_v2 }
 0x178   :  { %v4825_v58 = vpop.permute.xlu0 %4824  ;;  %v400_v59 = vpop.permute.xlu1 %399 }
 0x179   :  { %939 = vrot.lane.b32.xlu0 %v5205_v57, %s5091_s8  ;;  %4849 = vrot.lane.b32.xlu1 %v5142_v24, %s5092_s9  ;;  %v406_v61 = vsel %vm401_vm2, %v400_v59, 0  ;;  %v4827_v9 = vunpack.i.h.bf16 %v4825_v58  ;;  %v4826_v10 = vunpack.i.l.bf16 %v4825_v58 }
 0x17a   :  { %4402 = vmatpush3.bf16.xpose.msra.mxu1 %v406_v61 }
 0x17b   :  { %4407 = vmatprep.subr.bf16.mxu1 %v6325_v28  ;;  %v5241_v14 = vpack.c.bf16 %v4826_v10, %v4826_v10  ;;  %v5243_v15 = vpack.c.bf16 %v4827_v9, %v4827_v9 }
 0x17c   :  { %v548_v0 = vpop.permute.xlu0 %547  ;;  %v450_v1 = vpop.permute.xlu1 %449 }
 0x17d   :  { %988 = vrot.lane.b32.xlu0 %v5212_v62, %s5091_s8  ;;  %1037 = vrot.lane.b32.xlu1 %v5214_v63, %s5091_s8  ;;  %v455_v7 = vsel %vm401_vm2, %v450_v1, 0  ;;  %v553_v18 = vsel %vm401_vm2, %v548_v0, 0 }
 0x180   :  { %v499_v4 = vpop.permute.xlu1 %498  ;;  %v597_v8 = vpop.permute.xlu0 %596 }
 0x181   :  { %v504_v5 = vsel %vm401_vm2, %v499_v4, 0  ;;  %4854 = vrot.lane.b32.xlu0 %v5153_v35, %s5092_s9  ;;  %1086 = vrot.lane.b32.xlu1 %v5221_v3, %s5091_s8  ;;  %v602_v19 = vsel %vm401_vm2, %v597_v8, 0 }
 0x182   :  { %4404 = vmatmul.mubr.msk.bf16.vlgmr.msra.gmra.mxu1 %vm401_vm2, %v5157_v36  ;;  %4414 = vmatpush3.bf16.xpose.msra.mxu0 %v504_v5 }
 0x183   :  { %4408 = vmatpush3.bf16.xpose.msra.mxu1 %v455_v7  ;;  %4409 = vmatprep.mubr.msk.bf16.mxu1 %vm5089_vm1, %v6325_v28 }
 0x184   :  { %v4830_v11 = vpop.permute.xlu1 %4829  ;;  %4419 = vmatprep.subr.bf16.mxu1 %v6325_v28  ;;  %4425 = vmatprep.subr.bf16.mxu0 %v6325_v28  ;;  %v4835_v16 = vpop.permute.xlu0 %4834 }
 0x185   :  { %1135 = vrot.lane.b32.xlu0 %v5228_v6, %s5091_s8  ;;  %4859 = vrot.lane.b32.xlu1 %v5147_v34, %s5092_s9  ;;  %v4832_v12 = vunpack.i.h.bf16 %v4830_v11  ;;  %v4831_v13 = vunpack.i.l.bf16 %v4830_v11  ;;  %v4837_v20 = vunpack.i.h.bf16 %v4835_v16  ;;  %v4836_v21 = vunpack.i.l.bf16 %v4835_v16 }
 0x187   :  { %v5255_v22 = vpack.c.bf16 %v4832_v12, %v4832_v12  ;;  %v5257_v23 = vpack.c.bf16 %v4831_v13, %v4831_v13  ;;  %v5269_v25 = vpack.c.bf16 %v4837_v20, %v4837_v20  ;;  %v5271_v26 = vpack.c.bf16 %v4836_v21, %v4836_v21 }
 0x188   :  { %v646_v17 = vpop.permute.xlu1 %645  ;;  %v744_v35 = vpop.permute.xlu0 %743 }
 0x189   :  { %1184 = vrot.lane.b32.xlu0 %v5241_v14, %s5091_s8  ;;  %1233 = vrot.lane.b32.xlu1 %v5243_v15, %s5091_s8  ;;  %v651_v31 = vsel %vm401_vm2, %v646_v17, 0  ;;  %v749_v44 = vsel %vm401_vm2, %v744_v35, 0 }
 0x18a   :  { %4410 = vmatmul.mubr.msk.bf16.vlgmr.msra.gmra.mxu1 %vm401_vm2, %v5163_v38  ;;  %4416 = vmatmul.mubr.msk.bf16.vlgmr.msra.gmra.mxu0 %vm401_vm2, %v5171_v40 }
 0x18b   :  { %4420 = vmatpush3.bf16.xpose.msra.mxu1 %v553_v18  ;;  %4426 = vmatpush3.bf16.xpose.msra.mxu0 %v602_v19 }
 0x18c   :  { %v695_v24 = vpop.permute.xlu1 %694  ;;  %4421 = vmatprep.mubr.msk.bf16.mxu1 %vm5089_vm1, %v6325_v28  ;;  %4427 = vmatprep.mubr.msk.bf16.mxu0 %vm5089_vm1, %v6325_v28 }
 0x18d   :  { %1331 = vrot.lane.b32.xlu1 %v5255_v22, %s5091_s8  ;;  %1282 = vrot.lane.b32.xlu0 %v5257_v23, %s5091_s8  ;;  %v700_v32 = vsel %vm401_vm2, %v695_v24, 0 }
 0x18e   :  { %4431 = vmatprep.subr.bf16.mxu1 %v6325_v28  ;;  %4437 = vmatprep.subr.bf16.mxu0 %v6325_v28 }
 0x190   :  { %v4840_v27 = vpop.permute.xlu1 %4839 }
 0x191   :  { %v4842_v29 = vunpack.i.h.bf16 %v4840_v27  ;;  %v4841_v30 = vunpack.i.l.bf16 %v4840_v27  ;;  %1429 = vrot.lane.b32.xlu1 %v5269_v25, %s5091_s8  ;;  %1380 = vrot.lane.b32.xlu0 %v5271_v26, %s5091_s8 }
 0x192   :  { %4422 = vmatmul.mubr.msk.bf16.vlgmr.msra.gmra.mxu1 %vm401_vm2, %v5161_v37  ;;  %4428 = vmatmul.mubr.msk.bf16.vlgmr.msra.gmra.mxu0 %vm401_vm2, %v5169_v39 }
 0x193   :  { %4432 = vmatpush3.bf16.xpose.msra.mxu1 %v651_v31  ;;  %4438 = vmatpush3.bf16.xpose.msra.mxu0 %v700_v32  ;;  %v5283_v33 = vpack.c.bf16 %v4842_v29, %v4842_v29  ;;  %v5285_v34 = vpack.c.bf16 %v4841_v30, %v4841_v30 }
 0x194   :  { %4433 = vmatprep.mubr.msk.bf16.mxu1 %vm5089_vm1, %v6325_v28  ;;  %4439 = vmatprep.mubr.msk.bf16.mxu0 %vm5089_vm1, %v6325_v28 }
 0x195   :  { %1527 = vrot.lane.b32.xlu1 %v5283_v33, %s5091_s8  ;;  %1478 = vrot.lane.b32.xlu0 %v5285_v34, %s5091_s8 }
 0x196   :  { %4443 = vmatprep.subr.bf16.mxu1 %v6325_v28  ;;  %4449 = vmatprep.subr.bf16.mxu0 %v6325_v28 }
 0x19a   :  { %4434 = vmatmul.mubr.msk.bf16.vlgmr.msra.gmra.mxu1 %vm401_vm2, %v5181_v42  ;;  %4440 = vmatmul.mubr.msk.bf16.vlgmr.msra.gmra.mxu0 %vm401_vm2, %v5187_v43 }
 0x19b   :  { %4444 = vmatpush3.bf16.xpose.msra.mxu1 %v749_v44  ;;  %4445 = vmatprep.mubr.msk.bf16.mxu1 %vm5089_vm1, %v6325_v28 }
 0x19c   :  { %4455 = vmatprep.subr.bf16.mxu1 %v6325_v28  ;;  %4451 = vmatprep.mubr.msk.bf16.mxu0 %vm5089_vm1, %v6325_v28 }
 0x1a2   :  { %4446 = vmatmul.mubr.msk.bf16.vlgmr.msra.gmra.mxu1 %vm401_vm2, %v5179_v41 }
 0x1a3   :  { %4457 = vmatprep.mubr.msk.bf16.mxu1 %vm5089_vm1, %v6325_v28 }
 0x1e3   :  { %v793_v45 = vpop.permute.xlu0 %792  ;;  %v842_v46 = vpop.permute.xlu1 %841 }
 0x1e4   :  { %v798_v49 = vsel %vm401_vm2, %v793_v45, 0  ;;  %v847_v50 = vsel %vm401_vm2, %v842_v46, 0 }
 0x1e5   :  { %4450 = vmatpush3.bf16.xpose.msra.mxu0 %v798_v49  ;;  %4456 = vmatpush3.bf16.xpose.msra.mxu1 %v847_v50 }
 0x1e6   :  { %4461 = vmatprep.subr.bf16.mxu0 %v6325_v28  ;;  %4467 = vmatprep.subr.bf16.mxu1 %v6325_v28 }
 0x1e7   :  { %v4845_v51 = vpop.permute.xlu0 %4844  ;;  %v891_v53 = vpop.permute.xlu1 %890 }
 0x1e8   :  { %v4847_v54 = vunpack.i.h.bf16 %v4845_v51  ;;  %v4846_v55 = vunpack.i.l.bf16 %v4845_v51  ;;  %v896_v2 = vsel %vm401_vm2, %v891_v53, 0 }
 0x1ea   :  { %v5315_v56 = vpack.c.bf16 %v4847_v54, %v4847_v54  ;;  %v5317_v58 = vpack.c.bf16 %v4846_v55, %v4846_v55 }
 0x1eb   :  { %v940_v59 = vpop.permute.xlu0 %939  ;;  %v4850_v60 = vpop.permute.xlu1 %4849 }
 0x1ec   :  { %v945_v61 = vsel %vm401_vm2, %v940_v59, 0  ;;  %v4852_v0 = vunpack.i.h.bf16 %v4850_v60  ;;  %v4851_v1 = vunpack.i.l.bf16 %v4850_v60  ;;  %4452 = vmatmul.mubr.msk.bf16.vlgmr.msra.gmra.mxu0 %vm401_vm2, %v5192_v47  ;;  %4458 = vmatmul.mubr.msk.bf16.vlgmr.msra.gmra.mxu1 %vm401_vm2, %v5194_v48 }
 0x1ed   :  { %1625 = vrot.lane.b32.xlu1 %v5315_v56, %s5091_s8  ;;  %1576 = vrot.lane.b32.xlu0 %v5317_v58, %s5091_s8 }
 0x1ee   :  { %4462 = vmatpush3.bf16.xpose.msra.mxu0 %v896_v2  ;;  %4468 = vmatpush3.bf16.xpose.msra.mxu1 %v945_v61  ;;  %v5329_v4 = vpack.c.bf16 %v4852_v0, %v4852_v0  ;;  %v5331_v5 = vpack.c.bf16 %v4851_v1, %v4851_v1 }
 0x1ef   :  { %v989_v7 = vpop.permute.xlu0 %988  ;;  %v1038_v8 = vpop.permute.xlu1 %1037  ;;  %4463 = vmatprep.mubr.msk.bf16.mxu0 %vm5089_vm1, %v6325_v28  ;;  %4469 = vmatprep.mubr.msk.bf16.mxu1 %vm5089_vm1, %v6325_v28 }
 0x1f0   :  { %4473 = vmatprep.subr.bf16.mxu0 %v6325_v28  ;;  %4479 = vmatprep.subr.bf16.mxu1 %v6325_v28  ;;  %v994_v9 = vsel %vm401_vm2, %v989_v7, 0  ;;  %v1043_v10 = vsel %vm401_vm2, %v1038_v8, 0 }
 0x1f1   :  { %1723 = vrot.lane.b32.xlu1 %v5329_v4, %s5091_s8  ;;  %1674 = vrot.lane.b32.xlu0 %v5331_v5, %s5091_s8 }
 0x1f3   :  { %v4855_v11 = vpop.permute.xlu0 %4854  ;;  %v1087_v12 = vpop.permute.xlu1 %1086 }
 0x1f4   :  { %v4857_v13 = vunpack.i.h.bf16 %v4855_v11  ;;  %v4856_v16 = vunpack.i.l.bf16 %v4855_v11  ;;  %v1092_v30 = vsel %vm401_vm2, %v1087_v12, 0 }
 0x1f5   :  { %4464 = vmatmul.mubr.msk.bf16.vlgmr.msra.gmra.mxu0 %vm401_vm2, %v5200_v52  ;;  %4470 = vmatmul.mubr.msk.bf16.vlgmr.msra.gmra.mxu1 %vm401_vm2, %v5205_v57 }
 0x1f6   :  { %4474 = vmatpush3.bf16.xpose.msra.mxu0 %v994_v9  ;;  %4480 = vmatpush3.bf16.xpose.msra.mxu1 %v1043_v10  ;;  %v5349_v17 = vpack.c.bf16 %v4857_v13, %v4857_v13  ;;  %v5351_v18 = vpack.c.bf16 %v4856_v16, %v4856_v16 }
 0x1f7   :  { %v4860_v19 = vpop.permute.xlu1 %4859  ;;  %4475 = vmatprep.mubr.msk.bf16.mxu0 %vm5089_vm1, %v6325_v28  ;;  %4481 = vmatprep.mubr.msk.bf16.mxu1 %vm5089_vm1, %v6325_v28  ;;  %v1136_v24 = vpop.permute.xlu0 %1135 }
 0x1f8   :  { %v4862_v20 = vunpack.i.h.bf16 %v4860_v19  ;;  %v4861_v21 = vunpack.i.l.bf16 %v4860_v19  ;;  %1821 = vrot.lane.b32.xlu1 %v5349_v17, %s5091_s8  ;;  %1772 = vrot.lane.b32.xlu0 %v5351_v18, %s5091_s8  ;;  %v1141_v31 = vsel %vm401_vm2, %v1136_v24, 0 }
 0x1f9   :  { %4485 = vmatprep.subr.bf16.mxu0 %v6325_v28  ;;  %4491 = vmatprep.subr.bf16.mxu1 %v6325_v28 }
 0x1fa   :  { %v5363_v27 = vpack.c.bf16 %v4862_v20, %v4862_v20  ;;  %v5365_v29 = vpack.c.bf16 %v4861_v21, %v4861_v21 }
 0x1fb   :  { %v1185_v32 = vpop.permute.xlu0 %1184  ;;  %v1234_v35 = vpop.permute.xlu1 %1233 }
 0x1fc   :  { %6329 = vst [vmem:[#allocation12_spill] sm:$0xff] %v5363_v27  ;;  %6330 = vst [vmem:[#allocation13_spill] sm:$0xff] %v5365_v29  ;;  %1919 = vrot.lane.b32.xlu1 %v5363_v27, %s5091_s8  ;;  %1870 = vrot.lane.b32.xlu0 %v5365_v29, %s5091_s8  ;;  %v1190_v44 = vsel %vm401_vm2, %v1185_v32, 0  ;;  %v1239_v45 = vsel %vm401_vm2, %v1234_v35, 0 }
 0x1fd   :  { %4476 = vmatmul.mubr.msk.bf16.vlgmr.msra.gmra.mxu0 %vm401_vm2, %v5212_v62  ;;  %4482 = vmatmul.mubr.msk.bf16.vlgmr.msra.gmra.mxu1 %vm401_vm2, %v5214_v63 }
 0x1fe   :  { %4486 = vmatpush3.bf16.xpose.msra.mxu0 %v1092_v30  ;;  %4492 = vmatpush3.bf16.xpose.msra.mxu1 %v1141_v31 }
 0x1ff   :  { %4487 = vmatprep.mubr.msk.bf16.mxu0 %vm5089_vm1, %v6325_v28  ;;  %4493 = vmatprep.mubr.msk.bf16.mxu1 %vm5089_vm1, %v6325_v28 }
 0x200   :  { %2351 = vrot.lane.b32.xlu1 %v5157_v36, %s5085_s1  ;;  %2400 = vrot.lane.b32.xlu0 %v5163_v38, %s5085_s1  ;;  %v1332_v36 = vpop.permute.xlu1 %1331 }
 0x201   :  { %4497 = vmatprep.subr.bf16.mxu0 %v6325_v28  ;;  %4503 = vmatprep.subr.bf16.mxu1 %v6325_v28  ;;  %v1337_v38 = vsel %vm401_vm2, %v1332_v36, 0 }
 0x204   :  { %2448 = vrot.lane.b32.xlu1 %v5171_v40, %s5085_s1  ;;  %2496 = vrot.lane.b32.xlu0 %v5161_v37, %s5085_s1  ;;  %v1283_v37 = vpop.permute.xlu0 %1282 }
 0x205   :  { %4488 = vmatmul.mubr.msk.bf16.vlgmr.msra.gmra.mxu0 %vm401_vm2, %v5221_v3  ;;  %4494 = vmatmul.mubr.msk.bf16.vlgmr.msra.gmra.mxu1 %vm401_vm2, %v5228_v6  ;;  %v1288_v40 = vsel %vm401_vm2, %v1283_v37, 0 }
 0x206   :  { %4498 = vmatpush3.bf16.xpose.msra.mxu0 %v1190_v44  ;;  %4504 = vmatpush3.bf16.xpose.msra.mxu1 %v1239_v45 }
 0x207   :  { %4499 = vmatprep.mubr.msk.bf16.mxu0 %vm5089_vm1, %v6325_v28  ;;  %4505 = vmatprep.mubr.msk.bf16.mxu1 %vm5089_vm1, %v6325_v28 }
 0x208   :  { %2544 = vrot.lane.b32.xlu1 %v5169_v39, %s5085_s1  ;;  %2592 = vrot.lane.b32.xlu0 %v5181_v42, %s5085_s1  ;;  %v1430_v39 = vpop.permute.xlu1 %1429 }
 0x209   :  { %4509 = vmatprep.subr.bf16.mxu0 %v6325_v28  ;;  %4515 = vmatprep.subr.bf16.mxu1 %v6325_v28  ;;  %v1435_v42 = vsel %vm401_vm2, %v1430_v39, 0 }
 0x20c   :  { %2640 = vrot.lane.b32.xlu1 %v5187_v43, %s5085_s1  ;;  %2688 = vrot.lane.b32.xlu0 %v5179_v41, %s5085_s1  ;;  %v1381_v41 = vpop.permute.xlu0 %1380 }
 0x20d   :  { %4500 = vmatmul.mubr.msk.bf16.vlgmr.msra.gmra.mxu0 %vm401_vm2, %v5241_v14  ;;  %4506 = vmatmul.mubr.msk.bf16.vlgmr.msra.gmra.mxu1 %vm401_vm2, %v5243_v15  ;;  %v1386_v43 = vsel %vm401_vm2, %v1381_v41, 0 }
 0x20e   :  { %4510 = vmatpush3.bf16.xpose.msra.mxu0 %v1288_v40  ;;  %4516 = vmatpush3.bf16.xpose.msra.mxu1 %v1337_v38 }
 0x20f   :  { %4511 = vmatprep.mubr.msk.bf16.mxu0 %vm5089_vm1, %v6325_v28  ;;  %4517 = vmatprep.mubr.msk.bf16.mxu1 %vm5089_vm1, %v6325_v28 }
 0x210   :  { %2736 = vrot.lane.b32.xlu1 %v5192_v47, %s5085_s1  ;;  %2784 = vrot.lane.b32.xlu0 %v5194_v48, %s5085_s1  ;;  %v1528_v47 = vpop.permute.xlu1 %1527  ;;  %v1479_v48 = vpop.permute.xlu0 %1478 }
 0x211   :  { %4527 = vmatprep.subr.bf16.mxu1 %v6325_v28  ;;  %4521 = vmatprep.subr.bf16.mxu0 %v6325_v28 }
 0x214   :  { %2832 = vrot.lane.b32.xlu1 %v5200_v52, %s5085_s1  ;;  %2880 = vrot.lane.b32.xlu0 %v5205_v57, %s5085_s1  ;;  %v1533_v52 = vsel %vm401_vm2, %v1528_v47, 0  ;;  %v1484_v57 = vsel %vm401_vm2, %v1479_v48, 0 }
 0x215   :  { %4518 = vmatmul.mubr.msk.bf16.vlgmr.msra.gmra.mxu1 %vm401_vm2, %v5255_v22  ;;  %4512 = vmatmul.mubr.msk.bf16.vlgmr.msra.gmra.mxu0 %vm401_vm2, %v5257_v23 }
 0x216   :  { %4522 = vmatpush3.bf16.xpose.msra.mxu0 %v1386_v43  ;;  %4528 = vmatpush3.bf16.xpose.msra.mxu1 %v1435_v42 }
 0x217   :  { %4523 = vmatprep.mubr.msk.bf16.mxu0 %vm5089_vm1, %v6325_v28  ;;  %4529 = vmatprep.mubr.msk.bf16.mxu1 %vm5089_vm1, %v6325_v28 }
 0x218   :  { %2928 = vrot.lane.b32.xlu1 %v5212_v62, %s5085_s1  ;;  %3072 = vrot.lane.b32.xlu0 %v5228_v6, %s5085_s1  ;;  %v5093_v62 = vmov 1966171168  }
 0x219   :  { %4539 = vmatprep.subr.bf16.mxu1 %v6325_v28  ;;  %4533 = vmatprep.subr.bf16.mxu0 %v6325_v28 }
 0x21c   :  { %3024 = vrot.lane.b32.xlu1 %v5221_v3, %s5085_s1  ;;  %3168 = vrot.lane.b32.xlu0 %v5243_v15, %s5085_s1  ;;  %v289_v3 = vlaneseq }
 0x21d   :  { %4530 = vmatmul.mubr.msk.bf16.vlgmr.msra.gmra.mxu1 %vm401_vm2, %v5269_v25  ;;  %4524 = vmatmul.mubr.msk.bf16.vlgmr.msra.gmra.mxu0 %vm401_vm2, %v5271_v26 }
 0x21e   :  { %4534 = vmatpush3.bf16.xpose.msra.mxu0 %v1484_v57  ;;  %4540 = vmatpush3.bf16.xpose.msra.mxu1 %v1533_v52 }
 0x21f   :  { %4535 = vmatprep.mubr.msk.bf16.mxu0 %vm5089_vm1, %v6325_v28  ;;  %4541 = vmatprep.mubr.msk.bf16.mxu1 %vm5089_vm1, %v6325_v28 }
 0x220   :  { %3120 = vrot.lane.b32.xlu1 %v5241_v14, %s5085_s1  ;;  %3264 = vrot.lane.b32.xlu0 %v5255_v22, %s5085_s1  ;;  %v290_v14 = vshrl.u32 %v289_v3, 7  ;;  %v283_v22 = vld [vmem:[#allocation5] sm:$0xff] }
 0x221   :  { %4545 = vmatprep.subr.bf16.mxu0 %v6325_v28  ;;  %4551 = vmatprep.subr.bf16.mxu1 %v6325_v28  ;;  %v285_v49 = vcombine.high %v283_v22, %v283_v22 }
 0x222   :  { %v5489_v55 = vsub.s32 0, %v290_v14 }
 0x224   :  { %3216 = vrot.lane.b32.xlu1 %v5257_v23, %s5085_s1  ;;  %2976 = vrot.lane.b32.xlu0 %v5214_v63, %s5085_s1  ;;  %v287_v63 = vunpack.c.l.s4 %v5093_v62 }
 0x225   :  { %4542 = vmatmul.mubr.msk.bf16.vlgmr.msra.gmra.mxu1 %vm401_vm2, %v5283_v33  ;;  %4536 = vmatmul.mubr.msk.bf16.vlgmr.msra.gmra.mxu0 %vm401_vm2, %v5285_v34 }
 0x226   :  { %4547 = vmatprep.mubr.msk.bf16.mxu0 %vm5089_vm1, %v6325_v28  ;;  %4553 = vmatprep.mubr.msk.bf16.mxu1 %vm5089_vm1, %v6325_v28  ;;  %v288_v6 = vunpack.c.0.s8 %v287_v63 }
 0x228   :  { %3312 = vrot.lane.b32.xlu1 %v5271_v26, %s5085_s1  ;;  %3360 = vrot.lane.b32.xlu0 %v5269_v25, %s5085_s1  ;;  %v291_v15 = vsub.s32 %v288_v6, %v290_v14 }
 0x22a   :  { %v292_v23 = vrot.slane %v283_v22, %v291_v15  ;;  %v299_v53 = vrot.slane %v285_v49, %v291_v15 }
 0x22c   :  { %3408 = vrot.lane.b32.xlu1 %v5285_v34, %s5085_s1  ;;  %3456 = vrot.lane.b32.xlu0 %v5283_v33, %s5085_s1  ;;  %v308_v26 = vrot.slane %v292_v23, %v291_v15  ;;  %v300_v46 = vcombine.high %v292_v23, %v292_v23  ;;  %v315_v1 = vrot.slane %v299_v53, %v291_v15 }
 0x22d   :  { %v301_v10 = vcombine.high %v299_v53, %v299_v53 }
 0x22e   :  { %v330_v25 = vcombine.high %v308_v26, %v308_v26  ;;  %v322_v34 = vrot.slane %v300_v46, %v291_v15  ;;  %v342_v54 = vmul.f32 -1e+10, %v308_v26  ;;  %v346_v16 = vmul.f32 -1e+10, %v315_v1 }
 0x22f   :  { %v329_v32 = vrot.slane %v301_v10, %v291_v15  ;;  %v331_v36 = vcombine.high %v315_v1, %v315_v1 }
 0x230   :  { %3504 = vrot.lane.b32.xlu1 %v5317_v58, %s5085_s1  ;;  %v344_v51 = vmul.f32 -1e+10, %v330_v25  ;;  %v343_v60 = vmul.f32 -1e+10, %v322_v34  ;;  %v332_v0 = vcombine.high %v322_v34, %v322_v34  ;;  %v5495_v7 = vrot.slane %v342_v54, %v5489_v55 }
 0x231   :  { %v5515_v45 = vrot.slane %v346_v16, %v5489_v55  ;;  %v347_v42 = vmul.f32 -1e+10, %v329_v32  ;;  %v348_v52 = vmul.f32 -1e+10, %v331_v36  ;;  %v333_v23 = vcombine.high %v329_v32, %v329_v32 }
 0x232   :  { %v5492_v61 = vrot.slane %v344_v51, %v5489_v55  ;;  %v5498_v11 = vrot.slane %v343_v60, %v5489_v55  ;;  %v345_v13 = vmul.f32 -1e+10, %v332_v0 }
 0x233   :  { %v5532_v15 = vrot.slane %v347_v42, %v5489_v55  ;;  %v5535_v22 = vrot.slane %v348_v52, %v5489_v55  ;;  %v349_v51 = vmul.f32 -1e+10, %v333_v23 }
 0x234   :  { %v5512_v44 = vrot.slane %v345_v13, %v5489_v55 }
 0x242   :  { %v442_v50 = vpop.f32.mrf.mxu1 }
 0x243   :  { %v5504_v21 = vadd.f32 %v442_v50, %v5495_v7 }
 0x244   :  { %v4405_v33 = vpop.f32.mrf.mxu1 }
 0x245   :  { %v1967_v40 = vsel %vm401_vm2, %v5504_v21, -inf }
 0x246   :  { %v445_v59 = vpop.f32.mrf.mxu1 }
 0x248   :  { %v4406_v2 = vpop.f32.mrf.mxu1 }
 0x24a   :  { %v491_v8 = vpop.f32.mrf.mxu1  ;;  %v540_v9 = vpop.f32.mrf.mxu0 }
 0x24b   :  { %v5501_v12 = vadd.f32 %v540_v9, %v5492_v61  ;;  %v5509_v35 = vadd.f32 %v491_v8, %v5498_v11  ;;  %v5548_v8 = vrot.slane %v349_v51, %v5489_v55 }
 0x24c   :  { %v4411_v19 = vpop.f32.mrf.mxu1  ;;  %v4417_v20 = vpop.f32.mrf.mxu0 }
 0x24d   :  { %v1973_v24 = vsel %vm401_vm2, %v5501_v12, -inf  ;;  %v1970_v48 = vsel %vm401_vm2, %v5509_v35, -inf }
 0x24e   :  { %v494_v30 = vpop.f32.mrf.mxu1  ;;  %v543_v31 = vpop.f32.mrf.mxu0  ;;  %1974 = vmax.xlane.f32.xlu0 %v1973_v24 }
 0x250   :  { %v4412_v37 = vpop.f32.mrf.mxu1  ;;  %v4418_v38 = vpop.f32.mrf.mxu0 }
 0x252   :  { %v589_v39 = vpop.f32.mrf.mxu1  ;;  %v638_v41 = vpop.f32.mrf.mxu0  ;;  %1968 = vmax.xlane.f32.xlu0 %v1967_v40 }
 0x253   :  { %v5520_v43 = vadd.f32 %v589_v39, %v5512_v44  ;;  %v5523_v47 = vadd.f32 %v638_v41, %v5515_v45 }
 0x254   :  { %v4423_v57 = vpop.f32.mrf.mxu1  ;;  %v4429_v62 = vpop.f32.mrf.mxu0  ;;  %1971 = vmax.xlane.f32.xlu1 %v1970_v48 }
 0x255   :  { %v1976_v63 = vsel %vm401_vm2, %v5520_v43, -inf  ;;  %v1979_v14 = vsel %vm401_vm2, %v5523_v47, -inf }
 0x256   :  { %v592_v3 = vpop.f32.mrf.mxu1  ;;  %v641_v6 = vpop.f32.mrf.mxu0  ;;  %1977 = vmax.xlane.f32.xlu0 %v1976_v63 }
 0x258   :  { %v4424_v26 = vpop.f32.mrf.mxu1  ;;  %v4430_v46 = vpop.f32.mrf.mxu0  ;;  %1980 = vmax.xlane.f32.xlu1 %v1979_v14 }
 0x25a   :  { %v687_v25 = vpop.f32.mrf.mxu1  ;;  %v736_v49 = vpop.f32.mrf.mxu0 }
 0x25b   :  { %v5538_v50 = vadd.f32 %v687_v25, %v5532_v15  ;;  %v5541_v34 = vadd.f32 %v736_v49, %v5535_v22 }
 0x25c   :  { %v4435_v53 = vpop.f32.mrf.mxu1  ;;  %v4441_v33 = vpop.f32.mrf.mxu0 }
 0x25d   :  { %v1985_v54 = vsel %vm401_vm2, %v5541_v34, -inf  ;;  %v1982_v59 = vsel %vm401_vm2, %v5538_v50, -inf }
 0x25e   :  { %v690_v60 = vpop.f32.mrf.mxu1  ;;  %v739_v0 = vpop.f32.mrf.mxu0  ;;  %1986 = vmax.xlane.f32.xlu1 %v1985_v54  ;;  %1983 = vmax.xlane.f32.xlu0 %v1982_v59 }
 0x25f   :  { %v1626_v1 = vpop.permute.xlu1 %1625  ;;  %v1577_v2 = vpop.permute.xlu0 %1576 }
 0x260   :  { %v1631_v9 = vsel %vm401_vm2, %v1626_v1, 0  ;;  %v1582_v10 = vsel %vm401_vm2, %v1577_v2, 0  ;;  %v4436_v13 = vpop.f32.mrf.mxu1  ;;  %v4442_v16 = vpop.f32.mrf.mxu0 }
 0x261   :  { %4546 = vmatpush3.bf16.xpose.msra.mxu0 %v1582_v10  ;;  %4552 = vmatpush3.bf16.xpose.msra.mxu1 %v1631_v9 }
 0x262   :  { %v785_v19 = vpop.f32.mrf.mxu1  ;;  %4557 = vmatprep.subr.bf16.mxu0 %v6325_v28  ;;  %4563 = vmatprep.subr.bf16.mxu1 %v6325_v28 }
 0x263   :  { %v5555_v20 = vadd.f32 %v785_v19, %v5548_v8  ;;  %v1724_v30 = vpop.permute.xlu1 %1723  ;;  %v1675_v55 = vpop.permute.xlu0 %1674 }
 0x264   :  { %v4447_v24 = vpop.f32.mrf.mxu1  ;;  %v1729_v36 = vsel %vm401_vm2, %v1724_v30, 0  ;;  %v1680_v37 = vsel %vm401_vm2, %v1675_v55, 0 }
 0x265   :  { %v1988_v31 = vsel %vm401_vm2, %v5555_v20, -inf }
 0x266   :  { %v788_v32 = vpop.f32.mrf.mxu1  ;;  %1989 = vmax.xlane.f32.xlu0 %v1988_v31 }
 0x268   :  { %v4448_v38 = vpop.f32.mrf.mxu1  ;;  %4548 = vmatmul.mubr.msk.bf16.vlgmr.msra.gmra.mxu0 %vm401_vm2, %v5317_v58  ;;  %4554 = vmatmul.mubr.msk.bf16.vlgmr.msra.gmra.mxu1 %vm401_vm2, %v5315_v56 }
 0x269   :  { %4558 = vmatpush3.bf16.xpose.msra.mxu0 %v1680_v37  ;;  %4564 = vmatpush3.bf16.xpose.msra.mxu1 %v1729_v36 }
 0x26a   :  { %4565 = vmatprep.mubr.msk.bf16.mxu1 %vm5089_vm1, %v6325_v28  ;;  %4559 = vmatprep.mubr.msk.bf16.mxu0 %vm5089_vm1, %v6325_v28  ;;  %v1822_v40 = vpop.permute.xlu1 %1821  ;;  %v1773_v39 = vpop.permute.xlu0 %1772 }
 0x26b   :  { %4569 = vmatprep.subr.bf16.mxu0 %v6325_v28  ;;  %4575 = vmatprep.subr.bf16.mxu1 %v6325_v28  ;;  %v1827_v41 = vsel %vm401_vm2, %v1822_v40, 0  ;;  %v1778_v58 = vsel %vm401_vm2, %v1773_v39, 0 }
 0x26e   :  { %v1920_v42 = vpop.permute.xlu1 %1919  ;;  %v1871_v48 = vpop.permute.xlu0 %1870 }
 0x26f   :  { %v1925_v52 = vsel %vm401_vm2, %v1920_v42, 0  ;;  %v1876_v57 = vsel %vm401_vm2, %v1871_v48, 0 }
 0x270   :  { %4560 = vmatmul.mubr.msk.bf16.vlgmr.msra.gmra.mxu0 %vm401_vm2, %v5331_v5  ;;  %4566 = vmatmul.mubr.msk.bf16.vlgmr.msra.gmra.mxu1 %vm401_vm2, %v5329_v4 }
 0x271   :  { %4570 = vmatpush3.bf16.xpose.msra.mxu0 %v1778_v58  ;;  %4576 = vmatpush3.bf16.xpose.msra.mxu1 %v1827_v41 }
 0x272   :  { %4577 = vmatprep.mubr.msk.bf16.mxu1 %vm5089_vm1, %v6325_v28  ;;  %4571 = vmatprep.mubr.msk.bf16.mxu0 %vm5089_vm1, %v6325_v28  ;;  %v2352_v62 = vpop.permute.xlu1 %2351  ;;  %v2401_v63 = vpop.permute.xlu0 %2400 }
 0x273   :  { %4581 = vmatprep.subr.bf16.mxu0 %v6325_v28  ;;  %4587 = vmatprep.subr.bf16.mxu1 %v6325_v28  ;;  %v2358_v3 = vsel %vm2356_vm3, %v2352_v62, 0  ;;  %v2406_v6 = vsel %vm2356_vm3, %v2401_v63, 0 }
 0x276   :  { %v5607_v14 = vpop.permute.xlu1 %2448  ;;  %v5609_v23 = vpop.permute.xlu0 %2496 }
 0x278   :  { %4572 = vmatmul.mubr.msk.bf16.vlgmr.msra.gmra.mxu0 %vm401_vm2, %v5351_v18  ;;  %4578 = vmatmul.mubr.msk.bf16.vlgmr.msra.gmra.mxu1 %vm401_vm2, %v5349_v17 }
 0x279   :  { %4582 = vmatpush3.bf16.xpose.msra.mxu0 %v1876_v57  ;;  %4588 = vmatpush3.bf16.xpose.msra.mxu1 %v1925_v52 }
 0x27a   :  { %4589 = vmatprep.mubr.msk.bf16.mxu1 %vm5089_vm1, %v6325_v28  ;;  %4583 = vmatprep.mubr.msk.bf16.mxu0 %vm5089_vm1, %v6325_v28  ;;  %v5611_v26 = vpop.permute.xlu1 %2544  ;;  %v5613_v46 = vpop.permute.xlu0 %2592 }
 0x27b   :  { %4593 = vmatprep.subr.bf16.mxu0 %v6325_v28  ;;  %4599 = vmatprep.subr.bf16.mxu1 %v6325_v28 }
 0x27e   :  { %v5621_v59 = vpop.permute.xlu1 %2640  ;;  %v5627_v9 = vpop.permute.xlu0 %2688 }
 0x280   :  { %4584 = vmatmul.mubr.msk.bf16.vlgmr.msra.gmra.mxu0 %vm401_vm2, %v5365_v29  ;;  %4590 = vmatmul.mubr.msk.bf16.vlgmr.msra.gmra.mxu1 %vm401_vm2, %v5363_v27 }
 0x281   :  { %4594 = vmatpush3.bf16.msra.mxu0 %v2358_v3  ;;  %4600 = vmatpush3.bf16.msra.mxu1 %v2406_v6 }
 0x282   :  { %4601 = vmatprep.mubr.msk.bf16.mxu1 %vm5089_vm1, %v6325_v28  ;;  %4611 = vmatprep.subr.bf16.mxu1 %v6325_v28  ;;  %v5629_v24 = vpop.permute.xlu1 %2736  ;;  %v5637_v36 = vpop.permute.xlu0 %2784 }
 0x283   :  { %4595 = vmatprep.mubr.msk.bf16.mxu0 %vm5089_vm1, %v6325_v28  ;;  %4605 = vmatprep.subr.bf16.mxu0 %v6325_v28 }
 0x286   :  { %v5643_v42 = vpop.permute.xlu1 %2832  ;;  %v5645_v57 = vpop.permute.xlu0 %2880 }
 0x2ac   :  { %v834_v25 = vpop.f32.mrf.mxu0  ;;  %v883_v49 = vpop.f32.mrf.mxu1 }
 0x2ad   :  { %v5616_v51 = vadd.f32 %v834_v25, %v5495_v7  ;;  %v5619_v53 = vadd.f32 %v883_v49, %v5498_v11 }
 0x2ae   :  { %v4453_v33 = vpop.f32.mrf.mxu0  ;;  %v4459_v54 = vpop.f32.mrf.mxu1 }
 0x2af   :  { %v1991_v60 = vsel %vm401_vm2, %v5616_v51, -inf  ;;  %v1994_v0 = vsel %vm401_vm2, %v5619_v53, -inf }
 0x2b0   :  { %v837_v1 = vpop.f32.mrf.mxu0  ;;  %v886_v2 = vpop.f32.mrf.mxu1  ;;  %1992 = vmax.xlane.f32.xlu1 %v1991_v60  ;;  %1995 = vmax.xlane.f32.xlu0 %v1994_v0 }
 0x2b1   :  { %v5657_v60 = vpop.permute.xlu1 %2928  ;;  %v5659_v2 = vpop.permute.xlu0 %3072 }
 0x2b2   :  { %v4454_v10 = vpop.f32.mrf.mxu0  ;;  %v4460_v13 = vpop.f32.mrf.mxu1 }
 0x2b5   :  { %v932_v16 = vpop.f32.mrf.mxu0  ;;  %v981_v19 = vpop.f32.mrf.mxu1 }
 0x2b6   :  { %v5632_v30 = vadd.f32 %v932_v16, %v5492_v61  ;;  %v5635_v55 = vadd.f32 %v981_v19, %v5512_v44 }
 0x2b7   :  { %v4465_v31 = vpop.f32.mrf.mxu0  ;;  %v4471_v32 = vpop.f32.mrf.mxu1 }
 0x2b8   :  { %v1997_v37 = vsel %vm401_vm2, %v5632_v30, -inf  ;;  %v2000_v38 = vsel %vm401_vm2, %v5635_v55, -inf }
 0x2b9   :  { %v935_v40 = vpop.f32.mrf.mxu0  ;;  %v984_v39 = vpop.f32.mrf.mxu1  ;;  %1998 = vmax.xlane.f32.xlu1 %v1997_v37  ;;  %2001 = vmax.xlane.f32.xlu0 %v2000_v38 }
 0x2ba   :  { %v5667_v37 = vpop.permute.xlu1 %3024 }
 0x2bb   :  { %v4466_v41 = vpop.f32.mrf.mxu0  ;;  %v4472_v58 = vpop.f32.mrf.mxu1 }
 0x2bc   :  { %v5673_v58 = vpop.permute.xlu0 %3168 }
 0x2bd   :  { %v1030_v48 = vpop.f32.mrf.mxu0  ;;  %v1079_v52 = vpop.f32.mrf.mxu1  ;;  %6331 = vst [vmem:[#allocation14_spill] sm:$0xff] %v5673_v58 }
 0x2be   :  { %v5648_v62 = vadd.f32 %v1030_v48, %v5515_v45  ;;  %v5651_v63 = vadd.f32 %v1079_v52, %v5532_v15 }
 0x2bf   :  { %v4477_v3 = vpop.f32.mrf.mxu0  ;;  %v4483_v6 = vpop.f32.mrf.mxu1 }
 0x2c0   :  { %v2003_v25 = vsel %vm401_vm2, %v5648_v62, -inf  ;;  %v2006_v49 = vsel %vm401_vm2, %v5651_v63, -inf }
 0x2c1   :  { %v1033_v33 = vpop.f32.mrf.mxu0  ;;  %v1082_v54 = vpop.f32.mrf.mxu1  ;;  %2004 = vmax.xlane.f32.xlu1 %v2003_v25  ;;  %2007 = vmax.xlane.f32.xlu0 %v2006_v49 }
 0x2c2   :  { %v5675_v25 = vpop.permute.xlu1 %3120  ;;  %v5677_v54 = vpop.permute.xlu0 %3264 }
 0x2c3   :  { %v4478_v0 = vpop.f32.mrf.mxu0  ;;  %v4484_v1 = vpop.f32.mrf.mxu1  ;;  %6332 = vst [vmem:[#allocation15_spill] sm:$0xff] %v5675_v25  ;;  %6333 = vst [vmem:[#allocation16_spill] sm:$0xff] %v5677_v54 }
 0x2c5   :  { %v1128_v10 = vpop.f32.mrf.mxu0  ;;  %v1177_v13 = vpop.f32.mrf.mxu1 }
 0x2c6   :  { %v5662_v16 = vadd.f32 %v1128_v10, %v5535_v22  ;;  %v5665_v19 = vadd.f32 %v1177_v13, %v5548_v8 }
 0x2c7   :  { %v4489_v31 = vpop.f32.mrf.mxu0  ;;  %v4495_v32 = vpop.f32.mrf.mxu1 }
 0x2c8   :  { %v2009_v38 = vsel %vm401_vm2, %v5662_v16, -inf  ;;  %v2012_v40 = vsel %vm401_vm2, %v5665_v19, -inf  ;;  %v5679_v31 = vpop.permute.xlu1 %3216 }
 0x2c9   :  { %v1131_v39 = vpop.f32.mrf.mxu0  ;;  %v1180_v41 = vpop.f32.mrf.mxu1  ;;  %2010 = vmax.xlane.f32.xlu1 %v2009_v38  ;;  %2013 = vmax.xlane.f32.xlu0 %v2012_v40  ;;  %6334 = vst [vmem:[#allocation17_spill] sm:$0xff] %v5679_v31 }
 0x2ca   :  { %v5681_v40 = vpop.permute.xlu0 %2976 }
 0x2cb   :  { %v4490_v48 = vpop.f32.mrf.mxu0  ;;  %v4496_v52 = vpop.f32.mrf.mxu1 }
 0x2cc   :  { %v5683_v28 = vpop.permute.xlu1 %3312 }
 0x2cd   :  { %v1226_v3 = vpop.f32.mrf.mxu0  ;;  %v1275_v6 = vpop.f32.mrf.mxu1  ;;  %6335 = vst [vmem:[#allocation18_spill] sm:$0xff] %v5683_v28 }
 0x2cf   :  { %v4501_v49 = vpop.f32.mrf.mxu0  ;;  %v4507_v33 = vpop.f32.mrf.mxu1 }
 0x2d1   :  { %v1229_v0 = vpop.f32.mrf.mxu0  ;;  %v1278_v1 = vpop.f32.mrf.mxu1 }
 0x2d2   :  { %v5687_v0 = vpop.permute.xlu0 %3360 }
 0x2d3   :  { %v4502_v10 = vpop.f32.mrf.mxu0  ;;  %v4508_v13 = vpop.f32.mrf.mxu1  ;;  %6336 = vst [vmem:[#allocation19_spill] sm:$0xff] %v5687_v0 }
 0x2d5   :  { %v1324_v32 = vpop.f32.mrf.mxu0  ;;  %v1373_v38 = vpop.f32.mrf.mxu1 }
 0x2d7   :  { %v4513_v39 = vpop.f32.mrf.mxu0  ;;  %v4519_v41 = vpop.f32.mrf.mxu1 }
 0x2d8   :  { %v5695_v41 = vpop.permute.xlu1 %3408 }
 0x2d9   :  { %v1327_v48 = vpop.f32.mrf.mxu0  ;;  %v1376_v52 = vpop.f32.mrf.mxu1  ;;  %6337 = vst [vmem:[#allocation20_spill] sm:$0xff] %v5695_v41 }
 0x2da   :  { %3600 = vrot.lane.b32.xlu1 %v5331_v5, %s5085_s1  ;;  %v5697_v5 = vpop.permute.xlu0 %3456 }
 0x2db   :  { %v4514_v49 = vpop.f32.mrf.mxu0  ;;  %v4520_v33 = vpop.f32.mrf.mxu1  ;;  %6338 = vst [vmem:[#allocation21_spill] sm:$0xff] %v5697_v5 }
 0x2dc   :  { %v5701_v31 = vpop.permute.xlu1 %3504 }
 0x2dd   :  { %v5689_v1 = vpop.f32.mrf.mxu0  ;;  %v1471_v10 = vpop.f32.mrf.mxu1  ;;  %6339 = vst [vmem:[#allocation22_spill] sm:$0xff] %v5701_v31 }
 0x2de   :  { %3648 = vrot.lane.b32.xlu1 %v5329_v4, %s5085_s1  ;;  %v1975_v54 = vpop.xlane.xlu0 %1974 }
 0x2df   :  { %v4531_v13 = vpop.f32.mrf.mxu1  ;;  %3552 = vrot.lane.b32.xlu0 %v5315_v56, %s5085_s1  ;;  %v4525_v39 = vpop.f32.mrf.mxu0 }
 0x2e0   :  { %v1972_v27 = vpop.xlane.xlu1 %1971 }
 0x2e1   :  { %v1425_v48 = vpop.f32.mrf.mxu0  ;;  %v1474_v52 = vpop.f32.mrf.mxu1 }
 0x2e2   :  { %v1969_v58 = vpop.xlane.xlu0 %1968  ;;  %v2064_v48 = vsub.f32 %v5509_v35, %v1972_v27  ;;  %v2065_v52 = vsub.f32 %v5501_v12, %v1975_v54  ;;  %v5711_v27 = vadd.f32 %v1226_v3, %v5495_v7 }
 0x2e3   :  { %v4526_v49 = vpop.f32.mrf.mxu0  ;;  %v4532_v33 = vpop.f32.mrf.mxu1  ;;  %v2063_v5 = vsub.f32 %v5504_v21, %v1969_v58  ;;  %v5715_v21 = vadd.f32 %v1373_v38, %v5512_v44  ;;  %v5721_v58 = vadd.f32 %v1324_v32, %v5492_v61  ;;  %v5732_v32 = vadd.f32 %v1471_v10, %v5532_v15 }
 0x2e4   :  { %v2097_v49 = vmul.f32 1.442695, %v2064_v48  ;;  %v2099_v25 = vmul.f32 1.442695, %v2065_v52  ;;  %v2015_v3 = vsel %vm401_vm2, %v5711_v27, -inf }
 0x2e5   :  { %v5699_v28 = vpop.f32.mrf.mxu0  ;;  %v1569_v0 = vpop.f32.mrf.mxu1 }
 0x2e6   :  { %v1978_v33 = vpop.xlane.xlu0 %1977  ;;  %4866 = vpow2.f32 %v2097_v49  ;;  %v2030_v49 = vsel %vm401_vm2, %v5732_v32, -inf }
 0x2e7   :  { %v4543_v4 = vpop.f32.mrf.mxu1  ;;  %v4537_v13 = vpop.f32.mrf.mxu0  ;;  %v2066_v31 = vsub.f32 %v5520_v43, %v1978_v33  ;;  %4868 = vpow2.f32 %v2099_v25 }
 0x2e8   :  { %v2095_v4 = vmul.f32 1.442695, %v2063_v5 }
 0x2e9   :  { %v1572_v29 = vpop.f32.mrf.mxu1  ;;  %v1523_v56 = vpop.f32.mrf.mxu0  ;;  %v2101_v13 = vmul.f32 1.442695, %v2066_v31 }
 0x2ea   :  { %v5708_v29 = vadd.f32 %v1275_v6, %v5498_v11  ;;  %v1981_v56 = vpop.xlane.xlu1 %1980  ;;  %4870 = vpow2.f32 %v2095_v4  ;;  %v5752_v4 = vadd.f32 %v1569_v0, %v5548_v8 }
 0x2eb   :  { %v4544_v39 = vpop.f32.mrf.mxu1  ;;  %v4538_v41 = vpop.f32.mrf.mxu0  ;;  %v2067_v12 = vsub.f32 %v5523_v47, %v1981_v56  ;;  %4872 = vpow2.f32 %v2101_v13  ;;  %v2024_v47 = vsel %vm401_vm2, %v5715_v21, -inf }
 0x2ec   :  { %v1984_v41 = vpop.xlane.xlu0 %1983  ;;  %v2018_v43 = vsel %vm401_vm2, %v5708_v29, -inf }
 0x2ed   :  { %v2068_v35 = vsub.f32 %v5538_v50, %v1984_v41  ;;  %v2103_v6 = vmul.f32 1.442695, %v2067_v12  ;;  %v2021_v50 = vsel %vm401_vm2, %v5721_v58, -inf }
 0x2ee   :  { %v1987_v31 = vpop.xlane.xlu1 %1986 }
 0x2ef   :  { %v2105_v25 = vmul.f32 1.442695, %v2068_v35  ;;  %4874 = vpow2.f32 %v2103_v6  ;;  %v2069_v38 = vsub.f32 %v5541_v34, %v1987_v31  ;;  %v5749_v34 = vadd.f32 %v5689_v1, %v5515_v45 }
 0x2f0   :  { %v2036_v1 = vsel %vm401_vm2, %v5752_v4, -inf  ;;  %v1990_v0 = vpop.xlane.xlu0 %1989 }
 0x2f1   :  { %4876 = vpow2.f32 %v2105_v25  ;;  %v2107_v52 = vmul.f32 1.442695, %v2069_v38  ;;  %v2027_v12 = vsel %vm401_vm2, %v5749_v34, -inf }
 0x2f3   :  { %v5727_v54 = vpop.eup %4866  ;;  %4878 = vpow2.f32 %v2107_v52 }
 0x2f4   :  { %v2162_v5 = vsel %vm401_vm2, %v5727_v54, 0.0  ;;  %v5737_v39 = vpop.eup %4868 }
 0x2f5   :  { %v2165_v10 = vsel %vm401_vm2, %v5737_v39, 0.0 }
 0x2f7   :  { %v5739_v48 = vpop.eup %4870 }
 0x2f8   :  { %v5745_v33 = vpop.eup %4872  ;;  %v2159_v13 = vsel %vm401_vm2, %v5739_v48, 0.0 }
 0x2f9   :  { %v2168_v56 = vsel %vm401_vm2, %v5745_v33, 0.0 }
 0x2fc   :  { %v5758_v41 = vpop.eup %4874 }
 0x2fd   :  { %v2171_v6 = vsel %vm401_vm2, %v5758_v41, 0.0 }
 0x2fe   :  { %2019 = vmax.xlane.f32.xlu0 %v2018_v43  ;;  %v5764_v35 = vpop.eup %4876  ;;  %v5768_v43 = vadd.f32 %v5699_v28, %v5535_v22 }
 0x2ff   :  { %v2174_v25 = vsel %vm401_vm2, %v5764_v35, 0.0 }
 0x300   :  { %v5777_v31 = vpop.eup %4878 }
 0x301   :  { %v2177_v28 = vsel %vm401_vm2, %v5777_v31, 0.0 }
 0x302   :  { %2016 = vmax.xlane.f32.xlu1 %v2015_v3  ;;  %2025 = vmax.xlane.f32.xlu0 %v2024_v47  ;;  %v2070_v3 = vsub.f32 %v5555_v20, %v1990_v0  ;;  %v2033_v47 = vsel %vm401_vm2, %v5768_v43, -inf }
 0x306   :  { %2163 = vadd.xlane.f32.xlu0 %v2162_v5  ;;  %2022 = vmax.xlane.f32.xlu1 %v2021_v50  ;;  %v2109_v50 = vmul.f32 1.442695, %v2070_v3 }
 0x308   :  { %4880 = vpow2.f32 %v2109_v50 }
 0x30a   :  { %2031 = vmax.xlane.f32.xlu0 %v2030_v49  ;;  %2166 = vadd.xlane.f32.xlu1 %v2165_v10 }
 0x30e   :  { %2160 = vadd.xlane.f32.xlu1 %v2159_v13  ;;  %2169 = vadd.xlane.f32.xlu0 %v2168_v56 }
 0x312   :  { %2028 = vmax.xlane.f32.xlu1 %v2027_v12  ;;  %2037 = vmax.xlane.f32.xlu0 %v2036_v1 }
 0x315   :  { %v5791_v12 = vpop.eup %4880 }
 0x316   :  { %2172 = vadd.xlane.f32.xlu1 %v2171_v6  ;;  %2175 = vadd.xlane.f32.xlu0 %v2174_v25 }
 0x31a   :  { %2034 = vmax.xlane.f32.xlu1 %v2033_v47 }
 0x31e   :  { %2178 = vadd.xlane.f32.xlu1 %v2177_v28 }
 0x328   :  { %v1618_v38 = vpop.f32.mrf.mxu0  ;;  %v1667_v5 = vpop.f32.mrf.mxu1 }
 0x329   :  { %v5782_v52 = vadd.f32 %v1618_v38, %v5495_v7  ;;  %v5785_v49 = vadd.f32 %v1667_v5, %v5498_v11  ;;  %v2180_v11 = vsel %vm401_vm2, %v5791_v12, 0.0 }
 0x32a   :  { %v4549_v20 = vpop.f32.mrf.mxu0  ;;  %v4555_v10 = vpop.f32.mrf.mxu1 }
 0x32b   :  { %v2039_v13 = vsel %vm401_vm2, %v5782_v52, -inf  ;;  %v2042_v56 = vsel %vm401_vm2, %v5785_v49, -inf }
 0x32c   :  { %v1621_v1 = vpop.f32.mrf.mxu0  ;;  %v1670_v0 = vpop.f32.mrf.mxu1  ;;  %2040 = vmax.xlane.f32.xlu1 %v2039_v13  ;;  %2043 = vmax.xlane.f32.xlu0 %v2042_v56 }
 0x32e   :  { %v4550_v6 = vpop.f32.mrf.mxu0  ;;  %v4556_v7 = vpop.f32.mrf.mxu1 }
 0x330   :  { %v1716_v25 = vpop.f32.mrf.mxu0  ;;  %v1765_v3 = vpop.f32.mrf.mxu1  ;;  %2181 = vadd.xlane.f32.xlu0 %v2180_v11 }
 0x331   :  { %v5796_v47 = vadd.f32 %v1716_v25, %v5492_v61  ;;  %v5799_v50 = vadd.f32 %v1765_v3, %v5512_v44 }
 0x332   :  { %v4561_v28 = vpop.f32.mrf.mxu0  ;;  %v4567_v38 = vpop.f32.mrf.mxu1 }
 0x333   :  { %v2045_v5 = vsel %vm401_vm2, %v5796_v47, -inf  ;;  %v2048_v20 = vsel %vm401_vm2, %v5799_v50, -inf }
 0x334   :  { %v1719_v10 = vpop.f32.mrf.mxu0  ;;  %v1768_v13 = vpop.f32.mrf.mxu1  ;;  %2046 = vmax.xlane.f32.xlu1 %v2045_v5  ;;  %2049 = vmax.xlane.f32.xlu0 %v2048_v20 }
 0x336   :  { %v4562_v56 = vpop.f32.mrf.mxu0  ;;  %v4568_v1 = vpop.f32.mrf.mxu1 }
 0x338   :  { %v1814_v0 = vpop.f32.mrf.mxu0  ;;  %v1863_v61 = vpop.f32.mrf.mxu1 }
 0x339   :  { %v5806_v6 = vadd.f32 %v1814_v0, %v5515_v45  ;;  %v5809_v44 = vadd.f32 %v1863_v61, %v5532_v15  ;;  %v1993_v7 = vpop.xlane.xlu1 %1992  ;;  %v1996_v11 = vpop.xlane.xlu0 %1995 }
 0x33a   :  { %v4579_v25 = vpop.f32.mrf.mxu1  ;;  %v2071_v3 = vsub.f32 %v5616_v51, %v1993_v7  ;;  %v4573_v28 = vpop.f32.mrf.mxu0  ;;  %v2072_v38 = vsub.f32 %v5619_v53, %v1996_v11 }
 0x33b   :  { %v2051_v5 = vsel %vm401_vm2, %v5806_v6, -inf  ;;  %v2054_v20 = vsel %vm401_vm2, %v5809_v44, -inf }
 0x33c   :  { %v2111_v10 = vmul.f32 1.442695, %v2071_v3  ;;  %v2113_v45 = vmul.f32 1.442695, %v2072_v38  ;;  %v1817_v13 = vpop.f32.mrf.mxu0  ;;  %v1866_v56 = vpop.f32.mrf.mxu1  ;;  %2052 = vmax.xlane.f32.xlu1 %v2051_v5  ;;  %2055 = vmax.xlane.f32.xlu0 %v2054_v20 }
 0x33e   :  { %4882 = vpow2.f32 %v2111_v10  ;;  %v4574_v15 = vpop.f32.mrf.mxu0  ;;  %v4580_v1 = vpop.f32.mrf.mxu1 }
 0x33f   :  { %4884 = vpow2.f32 %v2113_v45 }
 0x340   :  { %v1912_v51 = vpop.f32.mrf.mxu0  ;;  %v1961_v0 = vpop.f32.mrf.mxu1 }
 0x341   :  { %v5818_v53 = vadd.f32 %v1912_v51, %v5535_v22  ;;  %v5821_v61 = vadd.f32 %v1961_v0, %v5548_v8 }
 0x342   :  { %v4591_v7 = vpop.f32.mrf.mxu1  ;;  %v1999_v11 = vpop.xlane.xlu1 %1998 }
 0x343   :  { %v2073_v25 = vsub.f32 %v5632_v30, %v1999_v11  ;;  %v4585_v3 = vpop.f32.mrf.mxu0  ;;  %v2002_v28 = vpop.xlane.xlu0 %2001  ;;  %v2057_v38 = vsel %vm401_vm2, %v5818_v53, -inf  ;;  %v2060_v5 = vsel %vm401_vm2, %v5821_v61, -inf }
 0x344   :  { %v2074_v20 = vsub.f32 %v5635_v55, %v2002_v28  ;;  %v1964_v10 = vpop.f32.mrf.mxu1  ;;  %2058 = vmax.xlane.f32.xlu1 %v2057_v38  ;;  %2061 = vmax.xlane.f32.xlu0 %v2060_v5 }
 0x345   :  { %v2115_v22 = vmul.f32 1.442695, %v2073_v25  ;;  %v1915_v8 = vpop.f32.mrf.mxu0 }
 0x346   :  { %v2117_v45 = vmul.f32 1.442695, %v2074_v20  ;;  %v4592_v13 = vpop.f32.mrf.mxu1 }
 0x347   :  { %4886 = vpow2.f32 %v2115_v22  ;;  %v4586_v56 = vpop.f32.mrf.mxu0 }
 0x348   :  { %4888 = vpow2.f32 %v2117_v45 }
 0x34a   :  { %v2005_v30 = vpop.xlane.xlu1 %2004  ;;  %v2008_v15 = vpop.xlane.xlu0 %2007 }
 0x34b   :  { %v5829_v1 = vpop.eup %4882  ;;  %v2075_v51 = vsub.f32 %v5648_v62, %v2005_v30  ;;  %v2076_v0 = vsub.f32 %v5651_v63, %v2008_v15 }
 0x34c   :  { %v5833_v7 = vpop.eup %4884  ;;  %v2183_v55 = vsel %vm401_vm2, %v5829_v1, 0.0 }
 0x34d   :  { %v2119_v11 = vmul.f32 1.442695, %v2075_v51  ;;  %v2121_v25 = vmul.f32 1.442695, %v2076_v0  ;;  %2184 = vadd.xlane.f32.xlu1 %v2183_v55  ;;  %v2186_v3 = vsel %vm401_vm2, %v5833_v7, 0.0 }
 0x34e   :  { %2187 = vadd.xlane.f32.xlu0 %v2186_v3 }
 0x34f   :  { %4890 = vpow2.f32 %v2119_v11 }
 0x350   :  { %4892 = vpow2.f32 %v2121_v25 }
 0x352   :  { %v2011_v28 = vpop.xlane.xlu1 %2010  ;;  %v2014_v38 = vpop.xlane.xlu0 %2013 }
 0x353   :  { %v2077_v62 = vsub.f32 %v5662_v16, %v2011_v28  ;;  %v2078_v63 = vsub.f32 %v5665_v19, %v2014_v38 }
 0x354   :  { %v5841_v5 = vpop.eup %4886 }
 0x355   :  { %v5843_v20 = vpop.eup %4888  ;;  %v2123_v10 = vmul.f32 1.442695, %v2077_v62  ;;  %v2125_v22 = vmul.f32 1.442695, %v2078_v63  ;;  %v2189_v8 = vsel %vm401_vm2, %v5841_v5, 0.0 }
 0x356   :  { %2190 = vadd.xlane.f32.xlu1 %v2189_v8  ;;  %v2192_v45 = vsel %vm401_vm2, %v5843_v20, 0.0  ;;  %v5865_v55 = vpop.permute.xlu1 %3600  ;;  %v5867_v11 = vpop.permute.xlu0 %3552 }
 0x357   :  { %4894 = vpow2.f32 %v2123_v10  ;;  %2193 = vadd.xlane.f32.xlu0 %v2192_v45 }
 0x358   :  { %4896 = vpow2.f32 %v2125_v22 }
 0x35a   :  { %v5869_v25 = vpop.permute.xlu1 %3648 }
 0x35b   :  { %6340 = vst [vmem:[#allocation23_spill] sm:$0xff] %v5869_v25 }
 0x35c   :  { %v5849_v13 = vpop.eup %4890 }
 0x35d   :  { %v5851_v16 = vpop.eup %4892  ;;  %v2195_v19 = vsel %vm401_vm2, %v5849_v13, 0.0 }
 0x35e   :  { %2196 = vadd.xlane.f32.xlu1 %v2195_v19  ;;  %v2198_v56 = vsel %vm401_vm2, %v5851_v16, 0.0 }
 0x35f   :  { %2199 = vadd.xlane.f32.xlu0 %v2198_v56 }
 0x364   :  { %v5857_v30 = vpop.eup %4894 }
 0x365   :  { %v5859_v15 = vpop.eup %4896  ;;  %v2201_v51 = vsel %vm401_vm2, %v5857_v30, 0.0 }
 0x366   :  { %2202 = vadd.xlane.f32.xlu1 %v2201_v51  ;;  %v2204_v0 = vsel %vm401_vm2, %v5859_v15, 0.0 }
 0x367   :  { %2205 = vadd.xlane.f32.xlu0 %v2204_v0 }
 0x387   :  { %v2020_v3 = vpop.xlane.xlu0 %2019 }
 0x388   :  { %v2080_v28 = vsub.f32 %v5708_v29, %v2020_v3 }
 0x38a   :  { %v2129_v38 = vmul.f32 1.442695, %v2080_v28 }
 0x38b   :  { %v2017_v62 = vpop.xlane.xlu1 %2016  ;;  %v2026_v63 = vpop.xlane.xlu0 %2025 }
 0x38c   :  { %4898 = vpow2.f32 %v2129_v38  ;;  %v2079_v10 = vsub.f32 %v5711_v27, %v2017_v62  ;;  %v2082_v22 = vsub.f32 %v5715_v21, %v2026_v63 }
 0x38e   :  { %v2127_v8 = vmul.f32 1.442695, %v2079_v10  ;;  %v2133_v45 = vmul.f32 1.442695, %v2082_v22 }
 0x38f   :  { %v2023_v19 = vpop.xlane.xlu1 %2022  ;;  %v2164_v56 = vpop.xlane.xlu0 %2163 }
 0x390   :  { %4900 = vpow2.f32 %v2127_v8  ;;  %v2081_v51 = vsub.f32 %v5721_v58, %v2023_v19 }
 0x391   :  { %4902 = vpow2.f32 %v2133_v45 }
 0x392   :  { %v2131_v0 = vmul.f32 1.442695, %v2081_v51  ;;  %4904 = vrcp.f32 %v2164_v56 }
 0x393   :  { %v2167_v25 = vpop.xlane.xlu1 %2166  ;;  %v2032_v29 = vpop.xlane.xlu0 %2031 }
 0x394   :  { %4906 = vpow2.f32 %v2131_v0  ;;  %v2084_v3 = vsub.f32 %v5732_v32, %v2032_v29 }
 0x396   :  { %v2137_v28 = vmul.f32 1.442695, %v2084_v3 }
 0x397   :  { %v2161_v38 = vpop.xlane.xlu1 %2160  ;;  %v2170_v27 = vpop.xlane.xlu0 %2169 }
 0x398   :  { %4908 = vpow2.f32 %v2137_v28 }
 0x399   :  { %v5876_v21 = vpop.eup %4898  ;;  %4910 = vrcp.f32 %v2161_v38 }
 0x39a   :  { %4912 = vrcp.f32 %v2170_v27  ;;  %v2210_v62 = vsel %vm401_vm2, %v5876_v21, 0.0  ;;  %v2502_v27 = vsel %vm2356_vm3, %v5609_v23, 0 }
 0x39b   :  { %v2029_v58 = vpop.xlane.xlu1 %2028  ;;  %2211 = vadd.xlane.f32.xlu0 %v2210_v62  ;;  %v2038_v63 = vpop.xlane.xlu0 %2037  ;;  %4914 = vrcp.f32 %v2167_v25 }
 0x39c   :  { %v2083_v10 = vsub.f32 %v5749_v34, %v2029_v58  ;;  %v2086_v22 = vsub.f32 %v5752_v4, %v2038_v63 }
 0x39d   :  { %v5882_v8 = vpop.eup %4900 }
 0x39e   :  { %v5884_v32 = vpop.eup %4902  ;;  %v2135_v45 = vmul.f32 1.442695, %v2083_v10  ;;  %v2141_v19 = vmul.f32 1.442695, %v2086_v22  ;;  %v2207_v56 = vsel %vm401_vm2, %v5882_v8, 0.0 }
 0x39f   :  { %v4905_v51 = vpop.eup %4904  ;;  %2208 = vadd.xlane.f32.xlu1 %v2207_v56  ;;  %v2173_v0 = vpop.xlane.xlu1 %2172  ;;  %v2216_v29 = vsel %vm401_vm2, %v5884_v32, 0.0 }
 0x3a0   :  { %4916 = vpow2.f32 %v2135_v45  ;;  %2217 = vadd.xlane.f32.xlu0 %v2216_v29  ;;  %v2176_v34 = vpop.xlane.xlu0 %2175  ;;  %v2288_v4 = vmul.f32 %v4905_v51, %v5727_v54  ;;  %v6341_v54 = vmov 0.0   ;;  %v2454_v29 = vsel %vm2356_vm3, %v5607_v14, 0 }
 0x3a1   :  { %v5891_v3 = vpop.eup %4906  ;;  %4918 = vpow2.f32 %v2141_v19 }
 0x3a2   :  { %v2320_v25 = vpack.c.bf16 %v2288_v4, %v2288_v4  ;;  %v2213_v28 = vsel %vm401_vm2, %v5891_v3, 0.0  ;;  %4920 = vrcp.f32 %v2176_v34  ;;  %v2598_v34 = vsel %vm2356_vm3, %v5613_v46, 0 }
 0x3a3   :  { %2214 = vadd.xlane.f32.xlu1 %v2213_v28  ;;  %v2035_v38 = vpop.xlane.xlu1 %2034  ;;  %4922 = vrcp.f32 %v2173_v0 }
 0x3a4   :  { %4602 = vmatmul.mubr.msk.bf16.vlgmr.msra.gmra.mxu1 %vm401_vm2, %v2320_v25  ;;  %v2085_v62 = vsub.f32 %v5768_v43, %v2035_v38 }
 0x3a5   :  { %v5899_v58 = vpop.eup %4908  ;;  %4612 = vmatpush3.bf16.msra.mxu1 %v2502_v27  ;;  %4613 = vmatprep.mubr.msk.bf16.mxu1 %vm5089_vm1, %v6341_v54  ;;  %v2550_v27 = vsel %vm2356_vm3, %v5611_v26, 0 }
 0x3a6   :  { %v4911_v63 = vpop.eup %4910  ;;  %v2139_v10 = vmul.f32 1.442695, %v2085_v62  ;;  %v2222_v22 = vsel %vm401_vm2, %v5899_v58, 0.0  ;;  %4623 = vmatprep.subr.bf16.mxu1 %v6341_v54 }
 0x3a7   :  { %v4913_v45 = vpop.eup %4912  ;;  %2223 = vadd.xlane.f32.xlu0 %v2222_v22  ;;  %v2287_v23 = vmul.f32 %v4911_v63, %v5739_v48  ;;  %v2179_v51 = vpop.xlane.xlu1 %2178 }
 0x3a8   :  { %4924 = vpow2.f32 %v2139_v10  ;;  %v2290_v43 = vmul.f32 %v4913_v45, %v5745_v33  ;;  %v4915_v56 = vpop.eup %4914  ;;  %v2694_v10 = vsel %vm2356_vm3, %v5627_v9, 0 }
 0x3a9   :  { %v2319_v19 = vpack.c.bf16 %v2287_v23, %v2287_v23  ;;  %4926 = vrcp.f32 %v2179_v51  ;;  %v2289_v48 = vmul.f32 %v4915_v56, %v5737_v39 }
 0x3aa   :  { %v2322_v0 = vpack.c.bf16 %v2290_v43, %v2290_v43 }
 0x3ab   :  { %4596 = vmatmul.mubr.msk.bf16.vlgmr.msra.gmra.mxu0 %vm401_vm2, %v2319_v19  ;;  %v2321_v28 = vpack.c.bf16 %v2289_v48, %v2289_v48 }
 0x3ac   :  { %4606 = vmatpush3.bf16.msra.mxu0 %v2454_v29  ;;  %4614 = vmatmul.mubr.msk.bf16.vlgmr.msra.gmra.mxu1 %vm401_vm2, %v2322_v0 }
 0x3ad   :  { %v5914_v4 = vpop.eup %4916  ;;  %4624 = vmatpush3.bf16.msra.mxu1 %v2598_v34  ;;  %4607 = vmatprep.mubr.msk.bf16.mxu0 %vm5089_vm1, %v6341_v54 }
 0x3ae   :  { %v5919_v33 = vpop.eup %4918  ;;  %v2219_v14 = vsel %vm401_vm2, %v5914_v4, 0.0  ;;  %4617 = vmatprep.subr.bf16.mxu0 %v6341_v54  ;;  %4625 = vmatprep.mubr.msk.bf16.mxu1 %vm5089_vm1, %v6341_v54 }
 0x3af   :  { %2220 = vadd.xlane.f32.xlu1 %v2219_v14  ;;  %v2228_v46 = vsel %vm401_vm2, %v5919_v33, 0.0  ;;  %4635 = vmatprep.subr.bf16.mxu1 %v6341_v54  ;;  %v4921_v25 = vpop.eup %4920 }
 0x3b0   :  { %2229 = vadd.xlane.f32.xlu0 %v2228_v46  ;;  %v2292_v39 = vmul.f32 %v4921_v25, %v5764_v35  ;;  %v4923_v38 = vpop.eup %4922  ;;  %v2742_v25 = vsel %vm2356_vm3, %v5629_v24, 0 }
 0x3b1   :  { %v2291_v26 = vmul.f32 %v4923_v38, %v5758_v41  ;;  %v2646_v41 = vsel %vm2356_vm3, %v5621_v59, 0 }
 0x3b2   :  { %v2324_v62 = vpack.c.bf16 %v2292_v39, %v2292_v39 }
 0x3b3   :  { %4608 = vmatmul.mubr.msk.bf16.vlgmr.msra.gmra.mxu0 %vm401_vm2, %v2321_v28  ;;  %v2323_v51 = vpack.c.bf16 %v2291_v26, %v2291_v26 }
 0x3b4   :  { %4618 = vmatpush3.bf16.msra.mxu0 %v2550_v27  ;;  %4619 = vmatprep.mubr.msk.bf16.mxu0 %vm5089_vm1, %v6341_v54  ;;  %v2790_v27 = vsel %vm2356_vm3, %v5637_v36, 0 }
 0x3b5   :  { %v5935_v63 = vpop.eup %4924  ;;  %4626 = vmatmul.mubr.msk.bf16.vlgmr.msra.gmra.mxu1 %vm401_vm2, %v2324_v62  ;;  %v2041_v22 = vpop.xlane.xlu1 %2040  ;;  %4629 = vmatprep.subr.bf16.mxu0 %v6341_v54 }
 0x3b6   :  { %v2044_v35 = vpop.xlane.xlu0 %2043  ;;  %4636 = vmatpush3.bf16.msra.mxu1 %v2694_v10  ;;  %v2087_v45 = vsub.f32 %v5782_v52, %v2041_v22  ;;  %v2225_v43 = vsel %vm401_vm2, %v5935_v63, 0.0  ;;  %4637 = vmatprep.mubr.msk.bf16.mxu1 %vm5089_vm1, %v6341_v54  ;;  %v4927_v0 = vpop.eup %4926 }
 0x3b7   :  { %v2088_v23 = vsub.f32 %v5785_v49, %v2044_v35  ;;  %2226 = vadd.xlane.f32.xlu1 %v2225_v43  ;;  %4647 = vmatprep.subr.bf16.mxu1 %v6341_v54  ;;  %v2293_v29 = vmul.f32 %v4927_v0, %v5777_v31 }
 0x3b8   :  { %v2143_v9 = vmul.f32 1.442695, %v2087_v45 }
 0x3b9   :  { %v2145_v19 = vmul.f32 1.442695, %v2088_v23  ;;  %v2325_v46 = vpack.c.bf16 %v2293_v29, %v2293_v29 }
 0x3ba   :  { %v2182_v56 = vpop.xlane.xlu0 %2181  ;;  %4928 = vpow2.f32 %v2143_v9 }
 0x3bb   :  { %4930 = vpow2.f32 %v2145_v19  ;;  %4620 = vmatmul.mubr.msk.bf16.vlgmr.msra.gmra.mxu0 %vm401_vm2, %v2323_v51 }
 0x3bc   :  { %4932 = vrcp.f32 %v2182_v56  ;;  %4630 = vmatpush3.bf16.msra.mxu0 %v2646_v41  ;;  %4631 = vmatprep.mubr.msk.bf16.mxu0 %vm5089_vm1, %v6341_v54 }
 0x3bd   :  { %v2047_v52 = vpop.xlane.xlu1 %2046  ;;  %4641 = vmatprep.subr.bf16.mxu0 %v6341_v54 }
 0x3be   :  { %v2050_v49 = vpop.xlane.xlu0 %2049  ;;  %v2089_v34 = vsub.f32 %v5796_v47, %v2047_v52 }
 0x3bf   :  { %v2090_v48 = vsub.f32 %v5799_v50, %v2050_v49 }
 0x3c0   :  { %v2147_v14 = vmul.f32 1.442695, %v2089_v34 }
 0x3c1   :  { %v2149_v59 = vmul.f32 1.442695, %v2090_v48  ;;  %v2838_v48 = vsel %vm2356_vm3, %v5643_v42, 0 }
 0x3c2   :  { %4934 = vpow2.f32 %v2147_v14 }
 0x3c3   :  { %4936 = vpow2.f32 %v2149_v59  ;;  %4632 = vmatmul.mubr.msk.bf16.vlgmr.msra.gmra.mxu0 %vm401_vm2, %v2325_v46 }
 0x3c4   :  { %4642 = vmatpush3.bf16.msra.mxu0 %v2742_v25  ;;  %4643 = vmatprep.mubr.msk.bf16.mxu0 %vm5089_vm1, %v6341_v54 }
 0x3c5   :  { %4653 = vmatprep.subr.bf16.mxu0 %v6341_v54  ;;  %v2053_v62 = vpop.xlane.xlu1 %2052  ;;  %v2056_v22 = vpop.xlane.xlu0 %2055 }
 0x3c6   :  { %v2091_v42 = vsub.f32 %v5806_v6, %v2053_v62  ;;  %v2934_v6 = vsel %vm2356_vm3, %v5657_v60, 0 }
 0x3c7   :  { %v5964_v31 = vpop.eup %4928 }
 0x3c8   :  { %v5966_v47 = vpop.eup %4930  ;;  %v2231_v50 = vsel %vm401_vm2, %v5964_v31, 0.0 }
 0x3c9   :  { %v4933_v28 = vpop.eup %4932  ;;  %2232 = vadd.xlane.f32.xlu1 %v2231_v50  ;;  %v2234_v24 = vsel %vm401_vm2, %v5966_v47, 0.0  ;;  %v2151_v50 = vmul.f32 1.442695, %v2091_v42 }
 0x3ca   :  { %2235 = vadd.xlane.f32.xlu0 %v2234_v24  ;;  %v2294_v39 = vmul.f32 %v4933_v28, %v5791_v12 }
 0x3cc   :  { %v2326_v38 = vpack.c.bf16 %v2294_v39, %v2294_v39 }
 0x3cd   :  { %v2059_v12 = vpop.xlane.xlu1 %2058  ;;  %v2062_v45 = vpop.xlane.xlu0 %2061 }
 0x3ce   :  { %4638 = vmatmul.mubr.msk.bf16.vlgmr.msra.gmra.mxu1 %vm401_vm2, %v2326_v38  ;;  %v2093_v28 = vsub.f32 %v5818_v53, %v2059_v12  ;;  %v2094_v38 = vsub.f32 %v5821_v61, %v2062_v45 }
 0x3cf   :  { %v5976_v10 = vpop.eup %4934  ;;  %4648 = vmatpush3.bf16.msra.mxu1 %v2790_v27  ;;  %4649 = vmatprep.mubr.msk.bf16.mxu1 %vm5089_vm1, %v6341_v54 }
 0x3d0   :  { %v5980_v35 = vpop.eup %4936  ;;  %v2237_v26 = vsel %vm401_vm2, %v5976_v10, 0.0  ;;  %4659 = vmatprep.subr.bf16.mxu1 %v6341_v54  ;;  %v2157_v61 = vmul.f32 1.442695, %v2094_v38  ;;  %v6347_v38 = vld [vmem:[#allocation17_spill] sm:$0xff] }
 0x3d1   :  { %2238 = vadd.xlane.f32.xlu1 %v2237_v26  ;;  %v2240_v36 = vsel %vm401_vm2, %v5980_v35, 0.0  ;;  %v3078_v26 = vsel %vm2356_vm3, %v5659_v2, 0 }
 0x3d2   :  { %2241 = vadd.xlane.f32.xlu0 %v2240_v36 }
 0x3d6   :  { %v2185_v23 = vpop.xlane.xlu1 %2184 }
 0x3d7   :  { %4938 = vrcp.f32 %v2185_v23  ;;  %v2188_v43 = vpop.xlane.xlu0 %2187  ;;  %v6342_v23 = vld [vmem:[#allocation15_spill] sm:$0xff] }
 0x3d8   :  { %4940 = vrcp.f32 %v2188_v43  ;;  %v3126_v43 = vsel %vm2356_vm3, %v6342_v23, 0 }
 0x3df   :  { %v2191_v9 = vpop.xlane.xlu1 %2190 }
 0x3e0   :  { %4942 = vrcp.f32 %v2191_v9  ;;  %v2194_v19 = vpop.xlane.xlu0 %2193 }
 0x3e1   :  { %4944 = vrcp.f32 %v2194_v19  ;;  %v6343_v19 = vld [vmem:[#allocation14_spill] sm:$0xff] }
 0x3e2   :  { %3744 = vrot.lane.b32.xlu1 %v5349_v17, %s5085_s1  ;;  %v2886_v17 = vsel %vm2356_vm3, %v5645_v57, 0  ;;  %v2092_v57 = vsub.f32 %v5809_v44, %v2056_v22  ;;  %v2982_v44 = vsel %vm2356_vm3, %v5681_v40, 0  ;;  %v3030_v22 = vsel %vm2356_vm3, %v5667_v37, 0 }
 0x3e4   :  { %v4939_v56 = vpop.eup %4938  ;;  %v2153_v39 = vmul.f32 1.442695, %v2092_v57 }
 0x3e5   :  { %v4941_v51 = vpop.eup %4940  ;;  %v2295_v0 = vmul.f32 %v4939_v56, %v5829_v1  ;;  %v3174_v56 = vsel %vm2356_vm3, %v6343_v19, 0 }
 0x3e6   :  { %v2296_v41 = vmul.f32 %v4941_v51, %v5833_v7 }
 0x3e7   :  { %v2197_v52 = vpop.xlane.xlu1 %2196  ;;  %v2327_v49 = vpack.c.bf16 %v2295_v0, %v2295_v0 }
 0x3e8   :  { %4946 = vrcp.f32 %v2197_v52  ;;  %3696 = vrot.lane.b32.xlu0 %v5351_v18, %s5085_s1  ;;  %v2200_v29 = vpop.xlane.xlu0 %2199  ;;  %v2328_v34 = vpack.c.bf16 %v2296_v41, %v2296_v41 }
 0x3e9   :  { %4948 = vrcp.f32 %v2200_v29  ;;  %4644 = vmatmul.mubr.msk.bf16.vlgmr.msra.gmra.mxu0 %vm401_vm2, %v2327_v49  ;;  %v6344_v49 = vld [vmem:[#allocation12_spill] sm:$0xff]  ;;  %v6345_v29 = vld [vmem:[#allocation13_spill] sm:$0xff] }
 0x3ea   :  { %4650 = vmatmul.mubr.msk.bf16.vlgmr.msra.gmra.mxu1 %vm401_vm2, %v2328_v34  ;;  %4654 = vmatpush3.bf16.msra.mxu0 %v2838_v48 }
 0x3eb   :  { %4660 = vmatpush3.bf16.msra.mxu1 %v2886_v17  ;;  %4655 = vmatprep.mubr.msk.bf16.mxu0 %vm5089_vm1, %v6341_v54 }
 0x3ec   :  { %4661 = vmatprep.mubr.msk.bf16.mxu1 %vm5089_vm1, %v6341_v54  ;;  %4665 = vmatprep.subr.bf16.mxu0 %v6341_v54 }
 0x3ed   :  { %v4943_v18 = vpop.eup %4942  ;;  %4671 = vmatprep.subr.bf16.mxu1 %v6341_v54 }
 0x3ee   :  { %v4945_v1 = vpop.eup %4944  ;;  %v2297_v7 = vmul.f32 %v4943_v18, %v5841_v5  ;;  %v2155_v5 = vmul.f32 1.442695, %v2093_v28 }
 0x3ef   :  { %v2203_v14 = vpop.xlane.xlu1 %2202  ;;  %v2298_v59 = vmul.f32 %v4945_v1, %v5843_v20 }
 0x3f0   :  { %4950 = vrcp.f32 %v2203_v14  ;;  %v2206_v46 = vpop.xlane.xlu0 %2205  ;;  %v2329_v25 = vpack.c.bf16 %v2297_v7, %v2297_v7 }
 0x3f1   :  { %4952 = vrcp.f32 %v2206_v46  ;;  %v2330_v24 = vpack.c.bf16 %v2298_v59, %v2298_v59  ;;  %v6346_v46 = vld [vmem:[#allocation16_spill] sm:$0xff] }
 0x3f2   :  { %4656 = vmatmul.mubr.msk.bf16.vlgmr.msra.gmra.mxu0 %vm401_vm2, %v2329_v25  ;;  %4954 = vpow2.f32 %v2151_v50  ;;  %v3270_v25 = vsel %vm2356_vm3, %v6346_v46, 0 }
 0x3f3   :  { %4662 = vmatmul.mubr.msk.bf16.vlgmr.msra.gmra.mxu1 %vm401_vm2, %v2330_v24  ;;  %4666 = vmatpush3.bf16.msra.mxu0 %v2934_v6  ;;  %4956 = vpow2.f32 %v2153_v39 }
 0x3f4   :  { %4672 = vmatpush3.bf16.msra.mxu1 %v2982_v44  ;;  %4667 = vmatprep.mubr.msk.bf16.mxu0 %vm5089_vm1, %v6341_v54  ;;  %4958 = vpow2.f32 %v2155_v5  ;;  %v3222_v44 = vsel %vm2356_vm3, %v6347_v38, 0 }
 0x3f5   :  { %v4947_v53 = vpop.eup %4946  ;;  %4673 = vmatprep.mubr.msk.bf16.mxu1 %vm5089_vm1, %v6341_v54  ;;  %4677 = vmatprep.subr.bf16.mxu0 %v6341_v54  ;;  %4960 = vpow2.f32 %v2157_v61 }
 0x3f6   :  { %v4949_v60 = vpop.eup %4948  ;;  %4683 = vmatprep.subr.bf16.mxu1 %v6341_v54  ;;  %v2299_v40 = vmul.f32 %v4947_v53, %v5849_v13 }
 0x3f7   :  { %v2300_v20 = vmul.f32 %v4949_v60, %v5851_v16  ;;  %v6348_v60 = vld [vmem:[#allocation19_spill] sm:$0xff] }
 0x3f8   :  { %v2331_v27 = vpack.c.bf16 %v2299_v40, %v2299_v40 }
 0x3f9   :  { %v2332_v62 = vpack.c.bf16 %v2300_v20, %v2300_v20 }
 0x3fa   :  { %4668 = vmatmul.mubr.msk.bf16.vlgmr.msra.gmra.mxu0 %vm401_vm2, %v2331_v27  ;;  %v6349_v27 = vld [vmem:[#allocation18_spill] sm:$0xff] }
 0x3fb   :  { %4674 = vmatmul.mubr.msk.bf16.vlgmr.msra.gmra.mxu1 %vm401_vm2, %v2332_v62  ;;  %4678 = vmatpush3.bf16.msra.mxu0 %v3030_v22 }
 0x3fc   :  { %4684 = vmatpush3.bf16.msra.mxu1 %v3078_v26  ;;  %4679 = vmatprep.mubr.msk.bf16.mxu0 %vm5089_vm1, %v6341_v54 }
 0x3fd   :  { %v4951_v13 = vpop.eup %4950  ;;  %4685 = vmatprep.mubr.msk.bf16.mxu1 %vm5089_vm1, %v6341_v54  ;;  %4689 = vmatprep.subr.bf16.mxu0 %v6341_v54 }
 0x3fe   :  { %v4953_v37 = vpop.eup %4952  ;;  %4695 = vmatprep.subr.bf16.mxu1 %v6341_v54  ;;  %v2301_v16 = vmul.f32 %v4951_v13, %v5857_v30  ;;  %v6350_v13 = vld [vmem:[#allocation21_spill] sm:$0xff] }
 0x3ff   :  { %v2302_v2 = vmul.f32 %v4953_v37, %v5859_v15  ;;  %v6039_v45 = vpop.eup %4954  ;;  %v3462_v37 = vsel %vm2356_vm3, %v6350_v13, 0 }
 0x400   :  { %v2333_v36 = vpack.c.bf16 %v2301_v16, %v2301_v16  ;;  %v6044_v9 = vpop.eup %4956  ;;  %v2243_v30 = vsel %vm401_vm2, %v6039_v45, 0.0 }
 0x401   :  { %v2334_v12 = vpack.c.bf16 %v2302_v2, %v2302_v2  ;;  %v6056_v15 = vpop.eup %4958  ;;  %v2246_v51 = vsel %vm401_vm2, %v6044_v9, 0.0 }
 0x402   :  { %4680 = vmatmul.mubr.msk.bf16.vlgmr.msra.gmra.mxu0 %vm401_vm2, %v2333_v36  ;;  %v6061_v0 = vpop.eup %4960  ;;  %v2249_v41 = vsel %vm401_vm2, %v6056_v15, 0.0  ;;  %v6351_v36 = vld [vmem:[#allocation20_spill] sm:$0xff] }
 0x403   :  { %4686 = vmatmul.mubr.msk.bf16.vlgmr.msra.gmra.mxu1 %vm401_vm2, %v2334_v12  ;;  %4690 = vmatpush3.bf16.msra.mxu0 %v3126_v43  ;;  %v2252_v52 = vsel %vm401_vm2, %v6061_v0, 0.0  ;;  %v3414_v12 = vsel %vm2356_vm3, %v6351_v36, 0  ;;  %v3558_v43 = vsel %vm2356_vm3, %v5867_v11, 0 }
 0x404   :  { %4696 = vmatpush3.bf16.msra.mxu1 %v3174_v56  ;;  %4697 = vmatprep.mubr.msk.bf16.mxu1 %vm5089_vm1, %v6341_v54 }
 0x405   :  { %4707 = vmatprep.subr.bf16.mxu1 %v6341_v54  ;;  %4691 = vmatprep.mubr.msk.bf16.mxu0 %vm5089_vm1, %v6341_v54 }
 0x406   :  { %2244 = vadd.xlane.f32.xlu1 %v2243_v30  ;;  %4701 = vmatprep.subr.bf16.mxu0 %v6341_v54  ;;  %v6352_v30 = vld [vmem:[#allocation22_spill] sm:$0xff] }
 0x407   :  { %2247 = vadd.xlane.f32.xlu0 %v2246_v51  ;;  %v3510_v51 = vsel %vm2356_vm3, %v6352_v30, 0 }
 0x40a   :  { %2250 = vadd.xlane.f32.xlu1 %v2249_v41 }
 0x40b   :  { %2253 = vadd.xlane.f32.xlu0 %v2252_v52 }
 0x41b   :  { %3840 = vrot.lane.b32.xlu1 %v6344_v49, %s5085_s1 }
 0x421   :  { %3792 = vrot.lane.b32.xlu0 %v6345_v29, %s5085_s1 }
 0x424   :  { %v2212_v34 = vpop.xlane.xlu0 %2211 }
 0x425   :  { %4962 = vrcp.f32 %v2212_v34 }
 0x428   :  { %v2209_v48 = vpop.xlane.xlu1 %2208 }
 0x429   :  { %4964 = vrcp.f32 %v2209_v48  ;;  %v2218_v17 = vpop.xlane.xlu0 %2217 }
 0x42a   :  { %4966 = vrcp.f32 %v2218_v17 }
 0x42c   :  { %v2215_v18 = vpop.xlane.xlu1 %2214 }
 0x42d   :  { %4968 = vrcp.f32 %v2215_v18 }
 0x430   :  { %v2224_v42 = vpop.xlane.xlu0 %2223 }
 0x431   :  { %4970 = vrcp.f32 %v2224_v42  ;;  %v3606_v42 = vsel %vm2356_vm3, %v5865_v55, 0 }
 0x432   :  { %v4963_v1 = vpop.eup %4962 }
 0x433   :  { %v2304_v57 = vmul.f32 %v4963_v1, %v5876_v21  ;;  %v6353_v1 = vld [vmem:[#allocation23_spill] sm:$0xff] }
 0x435   :  { %v2336_v7 = vpack.c.bf16 %v2304_v57, %v2304_v57  ;;  %v3654_v57 = vsel %vm2356_vm3, %v6353_v1, 0 }
 0x436   :  { %v4965_v14 = vpop.eup %4964 }
 0x437   :  { %v4967_v59 = vpop.eup %4966  ;;  %4698 = vmatmul.mubr.msk.bf16.vlgmr.msra.gmra.mxu1 %vm401_vm2, %v2336_v7  ;;  %v2303_v50 = vmul.f32 %v4965_v14, %v5882_v8 }
 0x438   :  { %4708 = vmatpush3.bf16.msra.mxu1 %v3270_v25  ;;  %v2221_v28 = vpop.xlane.xlu1 %2220  ;;  %4709 = vmatprep.mubr.msk.bf16.mxu1 %vm5089_vm1, %v6341_v54  ;;  %v2306_v21 = vmul.f32 %v4967_v59, %v5884_v32  ;;  %v3366_v32 = vsel %vm2356_vm3, %v6348_v60, 0 }
 0x439   :  { %4972 = vrcp.f32 %v2221_v28  ;;  %v2230_v24 = vpop.xlane.xlu0 %2229  ;;  %v2335_v6 = vpack.c.bf16 %v2303_v50, %v2303_v50  ;;  %4719 = vmatprep.subr.bf16.mxu1 %v6341_v54 }
 0x43a   :  { %v4969_v39 = vpop.eup %4968  ;;  %4974 = vrcp.f32 %v2230_v24  ;;  %v2338_v8 = vpack.c.bf16 %v2306_v21, %v2306_v21 }
 0x43b   :  { %4692 = vmatmul.mubr.msk.bf16.vlgmr.msra.gmra.mxu0 %vm401_vm2, %v2335_v6  ;;  %v2305_v53 = vmul.f32 %v4969_v39, %v5891_v3  ;;  %v3318_v3 = vsel %vm2356_vm3, %v6349_v27, 0 }
 0x43c   :  { %4702 = vmatpush3.bf16.msra.mxu0 %v3222_v44  ;;  %4703 = vmatprep.mubr.msk.bf16.mxu0 %vm5089_vm1, %v6341_v54 }
 0x43d   :  { %4713 = vmatprep.subr.bf16.mxu0 %v6341_v54  ;;  %v2337_v40 = vpack.c.bf16 %v2305_v53, %v2305_v53 }
 0x43e   :  { %v4971_v5 = vpop.eup %4970 }
 0x43f   :  { %4710 = vmatmul.mubr.msk.bf16.vlgmr.msra.gmra.mxu1 %vm401_vm2, %v2338_v8  ;;  %v2308_v20 = vmul.f32 %v4971_v5, %v5899_v58 }
 0x440   :  { %4720 = vmatpush3.bf16.msra.mxu1 %v3366_v32  ;;  %v2227_v61 = vpop.xlane.xlu1 %2226  ;;  %4721 = vmatprep.mubr.msk.bf16.mxu1 %vm5089_vm1, %v6341_v54 }
 0x441   :  { %4976 = vrcp.f32 %v2227_v61  ;;  %4731 = vmatprep.subr.bf16.mxu1 %v6341_v54  ;;  %v2340_v62 = vpack.c.bf16 %v2308_v20, %v2308_v20 }
 0x443   :  { %4704 = vmatmul.mubr.msk.bf16.vlgmr.msra.gmra.mxu0 %vm401_vm2, %v2337_v40 }
 0x444   :  { %4714 = vmatpush3.bf16.msra.mxu0 %v3318_v3  ;;  %4715 = vmatprep.mubr.msk.bf16.mxu0 %vm5089_vm1, %v6341_v54 }
 0x445   :  { %4725 = vmatprep.subr.bf16.mxu0 %v6341_v54 }
 0x446   :  { %v4973_v22 = vpop.eup %4972 }
 0x447   :  { %v4975_v26 = vpop.eup %4974  ;;  %4722 = vmatmul.mubr.msk.bf16.vlgmr.msra.gmra.mxu1 %vm401_vm2, %v2340_v62  ;;  %v2307_v58 = vmul.f32 %v4973_v22, %v5914_v4 }
 0x448   :  { %4732 = vmatpush3.bf16.msra.mxu1 %v3462_v37  ;;  %4733 = vmatprep.mubr.msk.bf16.mxu1 %vm5089_vm1, %v6341_v54  ;;  %v2310_v16 = vmul.f32 %v4975_v26, %v5919_v33 }
 0x449   :  { %v2339_v2 = vpack.c.bf16 %v2307_v58, %v2307_v58  ;;  %4743 = vmatprep.subr.bf16.mxu1 %v6341_v54 }
 0x44a   :  { %v2342_v23 = vpack.c.bf16 %v2310_v16, %v2310_v16 }
 0x44b   :  { %4716 = vmatmul.mubr.msk.bf16.vlgmr.msra.gmra.mxu0 %vm401_vm2, %v2339_v2 }
 0x44c   :  { %4726 = vmatpush3.bf16.msra.mxu0 %v3414_v12  ;;  %4727 = vmatprep.mubr.msk.bf16.mxu0 %vm5089_vm1, %v6341_v54 }
 0x44d   :  { %4737 = vmatprep.subr.bf16.mxu0 %v6341_v54 }
 0x44e   :  { %v4977_v4 = vpop.eup %4976 }
 0x44f   :  { %v2309_v33 = vmul.f32 %v4977_v4, %v5935_v63  ;;  %4734 = vmatmul.mubr.msk.bf16.vlgmr.msra.gmra.mxu1 %vm401_vm2, %v2342_v23 }
 0x450   :  { %4744 = vmatpush3.bf16.msra.mxu1 %v3558_v43  ;;  %4745 = vmatprep.mubr.msk.bf16.mxu1 %vm5089_vm1, %v6341_v54 }
 0x451   :  { %v2341_v19 = vpack.c.bf16 %v2309_v33, %v2309_v33  ;;  %4755 = vmatprep.subr.bf16.mxu1 %v6341_v54 }
 0x452   :  { %v2233_v56 = vpop.xlane.xlu1 %2232 }
 0x453   :  { %4978 = vrcp.f32 %v2233_v56  ;;  %v2236_v41 = vpop.xlane.xlu0 %2235  ;;  %4728 = vmatmul.mubr.msk.bf16.vlgmr.msra.gmra.mxu0 %vm401_vm2, %v2341_v19 }
 0x454   :  { %4980 = vrcp.f32 %v2236_v41  ;;  %4738 = vmatpush3.bf16.msra.mxu0 %v3510_v51  ;;  %4739 = vmatprep.mubr.msk.bf16.mxu0 %vm5089_vm1, %v6341_v54 }
 0x455   :  { %4749 = vmatprep.subr.bf16.mxu0 %v6341_v54 }
 0x45a   :  { %v2239_v11 = vpop.xlane.xlu1 %2238 }
 0x45b   :  { %4982 = vrcp.f32 %v2239_v11  ;;  %v2242_v63 = vpop.xlane.xlu0 %2241 }
 0x45c   :  { %4984 = vrcp.f32 %v2242_v63 }
 0x45e   :  { %v3745_v28 = vpop.permute.xlu1 %3744 }
 0x45f   :  { %v3697_v46 = vpop.permute.xlu0 %3696 }
 0x460   :  { %v4979_v52 = vpop.eup %4978  ;;  %v3702_v39 = vsel %vm2356_vm3, %v3697_v46, 0 }
 0x461   :  { %v4981_v49 = vpop.eup %4980  ;;  %v2311_v29 = vmul.f32 %v4979_v52, %v5964_v31 }
 0x462   :  { %v2312_v34 = vmul.f32 %v4981_v49, %v5966_v47 }
 0x463   :  { %v2343_v48 = vpack.c.bf16 %v2311_v29, %v2311_v29 }
 0x464   :  { %v2344_v17 = vpack.c.bf16 %v2312_v34, %v2312_v34  ;;  %v6129_v18 = vpop.f32.mrf.mxu1 }
 0x465   :  { %4740 = vmatmul.mubr.msk.bf16.vlgmr.msra.gmra.mxu0 %vm401_vm2, %v2343_v48 }
 0x466   :  { %v4603_v7 = vpop.f32.mrf.mxu1  ;;  %4746 = vmatmul.mubr.msk.bf16.vlgmr.msra.gmra.mxu1 %vm401_vm2, %v2344_v17  ;;  %4750 = vmatpush3.bf16.msra.mxu0 %v3606_v42 }
 0x467   :  { %4756 = vmatpush3.bf16.msra.mxu1 %v3654_v57  ;;  %4751 = vmatprep.mubr.msk.bf16.mxu0 %vm5089_vm1, %v6341_v54 }
 0x468   :  { %v4983_v31 = vpop.eup %4982  ;;  %v2445_v47 = vpop.f32.mrf.mxu1  ;;  %4757 = vmatprep.mubr.msk.bf16.mxu1 %vm5089_vm1, %v6341_v54  ;;  %4761 = vmatprep.subr.bf16.mxu0 %v6341_v54 }
 0x469   :  { %v4985_v55 = vpop.eup %4984  ;;  %v2313_v14 = vmul.f32 %v4983_v31, %v5976_v10  ;;  %4767 = vmatprep.subr.bf16.mxu1 %v6341_v54  ;;  %v3750_v10 = vsel %vm2356_vm3, %v3745_v28, 0 }
 0x46a   :  { %v2314_v59 = vmul.f32 %v4985_v55, %v5980_v35  ;;  %v4604_v25 = vpop.f32.mrf.mxu1 }
 0x46b   :  { %v2345_v50 = vpack.c.bf16 %v2313_v14, %v2313_v14  ;;  %v6145_v24 = vpop.f32.mrf.mxu0 }
 0x46c   :  { %v2346_v6 = vpack.c.bf16 %v2314_v59, %v2314_v59  ;;  %v6147_v21 = vpop.f32.mrf.mxu1 }
 0x46d   :  { %v4597_v38 = vpop.f32.mrf.mxu0  ;;  %4752 = vmatmul.mubr.msk.bf16.vlgmr.msra.gmra.mxu0 %vm401_vm2, %v2345_v50 }
 0x46e   :  { %v4615_v44 = vpop.f32.mrf.mxu1  ;;  %4758 = vmatmul.mubr.msk.bf16.vlgmr.msra.gmra.mxu1 %vm401_vm2, %v2346_v6  ;;  %4762 = vmatpush3.bf16.msra.mxu0 %v3702_v39 }
 0x46f   :  { %4768 = vmatpush3.bf16.msra.mxu1 %v3750_v10  ;;  %v2397_v35 = vpop.f32.mrf.mxu0  ;;  %4763 = vmatprep.mubr.msk.bf16.mxu0 %vm5089_vm1, %v6341_v54 }
 0x470   :  { %v2541_v8 = vpop.f32.mrf.mxu1  ;;  %4769 = vmatprep.mubr.msk.bf16.mxu1 %vm5089_vm1, %v6341_v54  ;;  %4773 = vmatprep.subr.bf16.mxu0 %v6341_v54 }
 0x471   :  { %v4598_v53 = vpop.f32.mrf.mxu0  ;;  %4779 = vmatprep.subr.bf16.mxu1 %v6341_v54 }
 0x472   :  { %v4616_v5 = vpop.f32.mrf.mxu1 }
 0x473   :  { %v6159_v60 = vpop.f32.mrf.mxu0 }
 0x475   :  { %v6161_v32 = vpop.f32.mrf.mxu1  ;;  %v4609_v61 = vpop.f32.mrf.mxu0 }
 0x477   :  { %v4627_v40 = vpop.f32.mrf.mxu1  ;;  %v2493_v20 = vpop.f32.mrf.mxu0 }
 0x479   :  { %v2637_v27 = vpop.f32.mrf.mxu1  ;;  %v4610_v3 = vpop.f32.mrf.mxu0 }
 0x47b   :  { %v4628_v62 = vpop.f32.mrf.mxu1  ;;  %v6163_v22 = vpop.f32.mrf.mxu0 }
 0x47d   :  { %v4621_v26 = vpop.f32.mrf.mxu0 }
 0x47f   :  { %v2589_v13 = vpop.f32.mrf.mxu0 }
 0x481   :  { %v4622_v37 = vpop.f32.mrf.mxu0 }
 0x483   :  { %v6165_v58 = vpop.f32.mrf.mxu0 }
 0x485   :  { %v4633_v16 = vpop.f32.mrf.mxu0 }
 0x487   :  { %v2685_v2 = vpop.f32.mrf.mxu0 }
 0x489   :  { %v4634_v36 = vpop.f32.mrf.mxu0 }
 0x48e   :  { %v6167_v12 = vpop.f32.mrf.mxu1 }
 0x48f   :  { %v2245_v23 = vpop.xlane.xlu1 %2244 }
 0x490   :  { %v4639_v4 = vpop.f32.mrf.mxu1  ;;  %4986 = vrcp.f32 %v2245_v23  ;;  %v2248_v43 = vpop.xlane.xlu0 %2247 }
 0x491   :  { %4988 = vrcp.f32 %v2248_v43 }
 0x492   :  { %v2733_v33 = vpop.f32.mrf.mxu1 }
 0x493   :  { %v2251_v19 = vpop.xlane.xlu1 %2250 }
 0x494   :  { %v4640_v56 = vpop.f32.mrf.mxu1  ;;  %4990 = vrcp.f32 %v2251_v19  ;;  %v2254_v30 = vpop.xlane.xlu0 %2253 }
 0x495   :  { %4992 = vrcp.f32 %v2254_v30 }
 0x497   :  { %v3841_v29 = vpop.permute.xlu1 %3840 }
 0x498   :  { %v3793_v52 = vpop.permute.xlu0 %3792  ;;  %v3846_v1 = vsel %vm2356_vm3, %v3841_v29, 0 }
 0x499   :  { %v3798_v42 = vsel %vm2356_vm3, %v3793_v52, 0 }
 0x49d   :  { %v4987_v51 = vpop.eup %4986 }
 0x49e   :  { %v4989_v41 = vpop.eup %4988  ;;  %v2315_v11 = vmul.f32 %v4987_v51, %v6039_v45 }
 0x49f   :  { %v2316_v63 = vmul.f32 %v4989_v41, %v6044_v9 }
 0x4a0   :  { %v2347_v49 = vpack.c.bf16 %v2315_v11, %v2315_v11 }
 0x4a1   :  { %v4991_v34 = vpop.eup %4990  ;;  %v2348_v48 = vpack.c.bf16 %v2316_v63, %v2316_v63 }
 0x4a2   :  { %v4993_v17 = vpop.eup %4992  ;;  %4764 = vmatmul.mubr.msk.bf16.vlgmr.msra.gmra.mxu0 %vm401_vm2, %v2347_v49  ;;  %v2317_v57 = vmul.f32 %v4991_v34, %v6056_v15 }
 0x4a3   :  { %4770 = vmatmul.mubr.msk.bf16.vlgmr.msra.gmra.mxu1 %vm401_vm2, %v2348_v48  ;;  %4774 = vmatpush3.bf16.msra.mxu0 %v3798_v42  ;;  %v2318_v45 = vmul.f32 %v4993_v17, %v6061_v0 }
 0x4a4   :  { %4780 = vmatpush3.bf16.msra.mxu1 %v3846_v1  ;;  %4775 = vmatprep.mubr.msk.bf16.mxu0 %vm5089_vm1, %v6341_v54  ;;  %v2349_v9 = vpack.c.bf16 %v2317_v57, %v2317_v57 }
 0x4a5   :  { %4781 = vmatprep.mubr.msk.bf16.mxu1 %vm5089_vm1, %v6341_v54  ;;  %v2350_v7 = vpack.c.bf16 %v2318_v45, %v2318_v45 }
 0x4a9   :  { %v2778_v31 = vpop.f32.mrf.mxu0 }
 0x4aa   :  { %v2826_v47 = vpop.f32.mrf.mxu1  ;;  %4776 = vmatmul.mubr.msk.bf16.vlgmr.msra.gmra.mxu0 %vm401_vm2, %v2349_v9  ;;  %3896 = vrot.lane.b32.xlu0 %v2778_v31, %s5083_s24 }
 0x4ab   :  { %4782 = vmatmul.mubr.msk.bf16.vlgmr.msra.gmra.mxu1 %vm401_vm2, %v2350_v7  ;;  %3898 = vrot.lane.b32.xlu1 %v2826_v47, %s5083_s24  ;;  %v4645_v15 = vpop.f32.mrf.mxu0 }
 0x4ac   :  { %v4651_v55 = vpop.f32.mrf.mxu1 }
 0x4ad   :  { %v2781_v14 = vpop.f32.mrf.mxu0 }
 0x4ae   :  { %v2829_v59 = vpop.f32.mrf.mxu1 }
 0x4af   :  { %v4646_v0 = vpop.f32.mrf.mxu0 }
 0x4b0   :  { %v4652_v46 = vpop.f32.mrf.mxu1 }
 0x4b2   :  { %v2874_v25 = vpop.f32.mrf.mxu0 }
 0x4b3   :  { %v2922_v54 = vpop.f32.mrf.mxu1  ;;  %3900 = vrot.lane.b32.xlu0 %v2874_v25, %s5083_s24 }
 0x4b4   :  { %3902 = vrot.lane.b32.xlu1 %v2922_v54, %s5083_s24  ;;  %v4657_v50 = vpop.f32.mrf.mxu0 }
 0x4b5   :  { %v4663_v28 = vpop.f32.mrf.mxu1 }
 0x4b6   :  { %v2877_v6 = vpop.f32.mrf.mxu0 }
 0x4b7   :  { %v2925_v39 = vpop.f32.mrf.mxu1 }
 0x4b8   :  { %v4658_v38 = vpop.f32.mrf.mxu0 }
 0x4b9   :  { %v4664_v10 = vpop.f32.mrf.mxu1 }
 0x4ba   :  { %v2970_v44 = vpop.f32.mrf.mxu0 }
 0x4bb   :  { %v3018_v35 = vpop.f32.mrf.mxu1  ;;  %3904 = vrot.lane.b32.xlu1 %v2970_v44, %s5083_s24 }
 0x4bc   :  { %3906 = vrot.lane.b32.xlu0 %v3018_v35, %s5083_s24  ;;  %v4669_v8 = vpop.f32.mrf.mxu0 }
 0x4bd   :  { %v4675_v53 = vpop.f32.mrf.mxu1 }
 0x4be   :  { %v2973_v5 = vpop.f32.mrf.mxu0 }
 0x4bf   :  { %v3021_v61 = vpop.f32.mrf.mxu1 }
 0x4c0   :  { %v4670_v40 = vpop.f32.mrf.mxu0 }
 0x4c1   :  { %v4676_v20 = vpop.f32.mrf.mxu1 }
 0x4c2   :  { %v3066_v27 = vpop.f32.mrf.mxu0 }
 0x4c3   :  { %v3114_v3 = vpop.f32.mrf.mxu1  ;;  %3908 = vrot.lane.b32.xlu1 %v3066_v27, %s5083_s24 }
 0x4c4   :  { %3910 = vrot.lane.b32.xlu0 %v3114_v3, %s5083_s24  ;;  %v4681_v62 = vpop.f32.mrf.mxu0 }
 0x4c5   :  { %v4687_v26 = vpop.f32.mrf.mxu1 }
 0x4c6   :  { %v3069_v13 = vpop.f32.mrf.mxu0 }
 0x4c7   :  { %v3117_v37 = vpop.f32.mrf.mxu1 }
 0x4c8   :  { %v4682_v16 = vpop.f32.mrf.mxu0 }
 0x4c9   :  { %v4688_v2 = vpop.f32.mrf.mxu1 }
 0x4f7   :  { %v3210_v36 = vpop.f32.mrf.mxu1 }
 0x4f8   :  { %3930 = vrot.lane.b32.xlu0 %v3210_v36, %s5094_s10 }
 0x4f9   :  { %v4699_v23 = vpop.f32.mrf.mxu1 }
 0x4fb   :  { %v3162_v4 = vpop.f32.mrf.mxu0  ;;  %v3213_v43 = vpop.f32.mrf.mxu1 }
 0x4fc   :  { %3928 = vrot.lane.b32.xlu1 %v3162_v4, %s5094_s10 }
 0x4fd   :  { %v4693_v33 = vpop.f32.mrf.mxu0  ;;  %v4700_v19 = vpop.f32.mrf.mxu1 }
 0x4ff   :  { %v3165_v56 = vpop.f32.mrf.mxu0  ;;  %v3306_v30 = vpop.f32.mrf.mxu1 }
 0x501   :  { %v4694_v51 = vpop.f32.mrf.mxu0  ;;  %v4711_v41 = vpop.f32.mrf.mxu1 }
 0x503   :  { %v3258_v11 = vpop.f32.mrf.mxu0  ;;  %v3309_v63 = vpop.f32.mrf.mxu1 }
 0x504   :  { %3932 = vrot.lane.b32.xlu0 %v3258_v11, %s5094_s10 }
 0x505   :  { %v4705_v52 = vpop.f32.mrf.mxu0  ;;  %v4712_v49 = vpop.f32.mrf.mxu1 }
 0x507   :  { %v3261_v29 = vpop.f32.mrf.mxu0  ;;  %v3402_v34 = vpop.f32.mrf.mxu1 }
 0x508   :  { %3934 = vrot.lane.b32.xlu0 %v3306_v30, %s5094_s10 }
 0x509   :  { %v4706_v48 = vpop.f32.mrf.mxu0  ;;  %v4723_v17 = vpop.f32.mrf.mxu1 }
 0x50b   :  { %v3354_v42 = vpop.f32.mrf.mxu0  ;;  %v3405_v1 = vpop.f32.mrf.mxu1 }
 0x50c   :  { %3936 = vrot.lane.b32.xlu1 %v3354_v42, %s5094_s10  ;;  %3938 = vrot.lane.b32.xlu0 %v3402_v34, %s5094_s10 }
 0x50d   :  { %v4717_v57 = vpop.f32.mrf.mxu0  ;;  %v4724_v45 = vpop.f32.mrf.mxu1 }
 0x50f   :  { %v3357_v9 = vpop.f32.mrf.mxu0  ;;  %v3498_v7 = vpop.f32.mrf.mxu1 }
 0x511   :  { %v4718_v31 = vpop.f32.mrf.mxu0  ;;  %v4735_v47 = vpop.f32.mrf.mxu1 }
 0x513   :  { %v3450_v15 = vpop.f32.mrf.mxu0  ;;  %v3501_v55 = vpop.f32.mrf.mxu1 }
 0x514   :  { %3940 = vrot.lane.b32.xlu1 %v3450_v15, %s5094_s10 }
 0x515   :  { %v4729_v14 = vpop.f32.mrf.mxu0  ;;  %v4736_v59 = vpop.f32.mrf.mxu1 }
 0x517   :  { %v3453_v0 = vpop.f32.mrf.mxu0 }
 0x518   :  { %3942 = vrot.lane.b32.xlu1 %v3498_v7, %s5094_s10 }
 0x519   :  { %v4730_v46 = vpop.f32.mrf.mxu0 }
 0x51c   :  { %v3897_v51 = vpop.permute.xlu0 %3896 }
 0x51d   :  { %v3899_v41 = vpop.permute.xlu1 %3898  ;;  %v3984_v47 = vsel %vm401_vm2, %v6145_v24, %v3897_v51 }
 0x51e   :  { %v3985_v55 = vsel %vm401_vm2, %v6129_v18, %v3899_v41 }
 0x525   :  { %v3546_v25 = vpop.f32.mrf.mxu0  ;;  %v3901_v11 = vpop.permute.xlu0 %3900 }
 0x526   :  { %v3594_v54 = vpop.f32.mrf.mxu1  ;;  %3960 = vrot.lane.b32.xlu1 %v3546_v25, %s5095_s11  ;;  %v3903_v63 = vpop.permute.xlu1 %3902  ;;  %v3986_v0 = vsel %vm401_vm2, %v6159_v60, %v3901_v11 }
 0x527   :  { %3962 = vrot.lane.b32.xlu0 %v3594_v54, %s5095_s11  ;;  %v4741_v50 = vpop.f32.mrf.mxu0  ;;  %v3987_v59 = vsel %vm401_vm2, %v6147_v21, %v3903_v63 }
 0x528   :  { %v4747_v28 = vpop.f32.mrf.mxu1 }
 0x529   :  { %v3549_v6 = vpop.f32.mrf.mxu0 }
 0x52a   :  { %v3597_v39 = vpop.f32.mrf.mxu1 }
 0x52b   :  { %v4742_v38 = vpop.f32.mrf.mxu0 }
 0x52c   :  { %v4748_v10 = vpop.f32.mrf.mxu1 }
 0x52d   :  { %v3642_v44 = vpop.f32.mrf.mxu0  ;;  %v3905_v49 = vpop.permute.xlu1 %3904 }
 0x52e   :  { %v3690_v35 = vpop.f32.mrf.mxu1  ;;  %3964 = vrot.lane.b32.xlu1 %v3642_v44, %s5095_s11  ;;  %v3907_v52 = vpop.permute.xlu0 %3906  ;;  %v3988_v24 = vsel %vm401_vm2, %v6163_v22, %v3905_v49 }
 0x52f   :  { %3966 = vrot.lane.b32.xlu0 %v3690_v35, %s5095_s11  ;;  %v4753_v8 = vpop.f32.mrf.mxu0  ;;  %v3989_v54 = vsel %vm401_vm2, %v6161_v32, %v3907_v52 }
 0x530   :  { %v4759_v53 = vpop.f32.mrf.mxu1 }
 0x531   :  { %v3645_v5 = vpop.f32.mrf.mxu0 }
 0x532   :  { %v3693_v61 = vpop.f32.mrf.mxu1 }
 0x533   :  { %v4754_v40 = vpop.f32.mrf.mxu0 }
 0x534   :  { %v4760_v20 = vpop.f32.mrf.mxu1 }
 0x535   :  { %v3909_v34 = vpop.permute.xlu1 %3908 }
 0x536   :  { %v3911_v29 = vpop.permute.xlu0 %3910  ;;  %v3990_v18 = vsel %vm401_vm2, %v6165_v58, %v3909_v34 }
 0x537   :  { %v3991_v21 = vsel %vm401_vm2, %v6167_v12, %v3911_v29 }
 0x562   :  { %v3738_v27 = vpop.f32.mrf.mxu0 }
 0x563   :  { %v3786_v3 = vpop.f32.mrf.mxu1  ;;  %3968 = vrot.lane.b32.xlu1 %v3738_v27, %s5095_s11 }
 0x564   :  { %3970 = vrot.lane.b32.xlu0 %v3786_v3, %s5095_s11  ;;  %v4765_v62 = vpop.f32.mrf.mxu0 }
 0x565   :  { %v4771_v26 = vpop.f32.mrf.mxu1 }
 0x566   :  { %v3741_v13 = vpop.f32.mrf.mxu0 }
 0x567   :  { %v3789_v37 = vpop.f32.mrf.mxu1 }
 0x568   :  { %v4766_v16 = vpop.f32.mrf.mxu0 }
 0x569   :  { %v4772_v2 = vpop.f32.mrf.mxu1 }
 0x56a   :  { %v3834_v36 = vpop.f32.mrf.mxu0  ;;  %v3931_v48 = vpop.permute.xlu0 %3930 }
 0x56b   :  { %v3882_v23 = vpop.f32.mrf.mxu1  ;;  %3972 = vrot.lane.b32.xlu0 %v3834_v36, %s5095_s11  ;;  %v3994_v46 = vsel %vm3992_vm4, %v3985_v55, %v3931_v48 }
 0x56c   :  { %3974 = vrot.lane.b32.xlu1 %v3882_v23, %s5095_s11  ;;  %v4777_v4 = vpop.f32.mrf.mxu0 }
 0x56d   :  { %v4783_v43 = vpop.f32.mrf.mxu1 }
 0x56e   :  { %v3837_v33 = vpop.f32.mrf.mxu0  ;;  %v3929_v17 = vpop.permute.xlu1 %3928 }
 0x56f   :  { %v3885_v19 = vpop.f32.mrf.mxu1  ;;  %v3993_v14 = vsel %vm3992_vm4, %v3984_v47, %v3929_v17 }
 0x570   :  { %v4778_v56 = vpop.f32.mrf.mxu0 }
 0x571   :  { %v4784_v30 = vpop.f32.mrf.mxu1 }
 0x576   :  { %v3933_v42 = vpop.permute.xlu0 %3932 }
 0x577   :  { %v3995_v60 = vsel %vm3992_vm4, %v3986_v0, %v3933_v42 }
 0x57a   :  { %v3935_v45 = vpop.permute.xlu0 %3934 }
 0x57b   :  { %v3996_v6 = vsel %vm3992_vm4, %v3987_v59, %v3935_v45 }
 0x57e   :  { %v3937_v1 = vpop.permute.xlu1 %3936  ;;  %v3939_v7 = vpop.permute.xlu0 %3938 }
 0x57f   :  { %v3997_v39 = vsel %vm3992_vm4, %v3988_v24, %v3937_v1  ;;  %v3998_v22 = vsel %vm3992_vm4, %v3989_v54, %v3939_v7 }
 0x586   :  { %v3941_v57 = vpop.permute.xlu1 %3940 }
 0x587   :  { %v6233_v20 = vsel %vm3992_vm4, %v3990_v18, %v3941_v57 }
 0x58a   :  { %v3943_v9 = vpop.permute.xlu1 %3942 }
 0x58b   :  { %v6236_v27 = vsel %vm3992_vm4, %v3991_v21, %v3943_v9 }
 0x598   :  { %v3961_v31 = vpop.permute.xlu1 %3960 }
 0x599   :  { %v3963_v15 = vpop.permute.xlu0 %3962  ;;  %v4002_v25 = vsel %vm4001_vm5, %v3993_v14, %v3961_v31 }
 0x59a   :  { %v4003_v50 = vsel %vm4001_vm5, %v3994_v46, %v3963_v15  ;;  %v4041_v38 = vrot.slane %v4002_v25, 1  ;;  %v4060_v32 = vrot.slane %v4002_v25, 2  ;;  %v4098_v10 = vrot.slane %v4002_v25, 4 }
 0x59b   :  { %v4114_v58 = vrot.slane %v4002_v25, 5  ;;  %v4132_v44 = vrot.slane %v4002_v25, 6  ;;  %v4018_v35 = vrot.slane %v4003_v50, 7  ;;  %v4061_v5 = vrot.slane %v4003_v50, 1 }
 0x59c   :  { %v4099_v12 = vrot.slane %v4003_v50, 3  ;;  %v4115_v61 = vrot.slane %v4003_v50, 4  ;;  %v4133_v40 = vrot.slane %v4003_v50, 5  ;;  %v4079_v3 = vrot.slane %v4002_v25, 3 }
 0x59d   :  { %v4150_v62 = vrot.slane %v4002_v25, 7  ;;  %v4080_v26 = vrot.slane %v4003_v50, 2  ;;  %v4020_v2 = vsel %vm4019_vm6, %v4018_v35, %v4002_v25  ;;  %v4151_v36 = vrot.slane %v4003_v50, 6 }
 0x59e   :  { %v4042_v23 = vsel %vm4019_vm6, %v4003_v50, %v4041_v38  ;;  %v4100_v43 = vsel %vm4019_vm6, %v4099_v12, %v4098_v10  ;;  %v4116_v33 = vsel %vm4019_vm6, %v4115_v61, %v4114_v58  ;;  %v4134_v19 = vsel %vm4019_vm6, %v4133_v40, %v4132_v44 }
 0x59f   :  { %v4062_v56 = vsel %vm4019_vm6, %v4061_v5, %v4060_v32  ;;  %v4081_v42 = vsel %vm4019_vm6, %v4080_v26, %v4079_v3  ;;  %v4152_v9 = vsel %vm4019_vm6, %v4151_v36, %v4150_v62 }
 0x5a0   :  { %v3965_v28 = vpop.permute.xlu1 %3964 }
 0x5a1   :  { %v4004_v8 = vsel %vm4001_vm5, %v3995_v60, %v3965_v28  ;;  %v3967_v53 = vpop.permute.xlu0 %3966 }
 0x5a2   :  { %v4043_v13 = vrot.slane %v4004_v8, 7  ;;  %v4117_v37 = vrot.slane %v4004_v8, 3  ;;  %v4005_v16 = vsel %vm4001_vm5, %v3996_v6, %v3967_v53  ;;  %v4135_v4 = vrot.slane %v4004_v8, 4 }
 0x5a3   :  { %v4082_v30 = vrot.slane %v4004_v8, 1  ;;  %v4153_v51 = vrot.slane %v4004_v8, 5  ;;  %v4119_v41 = vrot.slane %v4005_v16, 2  ;;  %v4045_v11 = vrot.slane %v4005_v16, 6 }
 0x5a4   :  { %v4118_v63 = vsel %vm4022_vm7, %v4117_v37, %v4116_v33  ;;  %v4044_v52 = vsel %vm4022_vm7, %v4043_v13, %v4042_v23  ;;  %v4137_v49 = vrot.slane %v4005_v16, 3  ;;  %v4064_v29 = vrot.slane %v4005_v16, 7 }
 0x5a5   :  { %v4101_v34 = vrot.slane %v4004_v8, 2  ;;  %v4136_v48 = vsel %vm4022_vm7, %v4135_v4, %v4134_v19  ;;  %v4063_v17 = vsel %vm4022_vm7, %v4004_v8, %v4062_v56  ;;  %v4021_v1 = vrot.slane %v4004_v8, 6 }
 0x5a6   :  { %v4024_v57 = vrot.slane %v4005_v16, 5  ;;  %v4103_v45 = vrot.slane %v4005_v16, 1  ;;  %v4120_v31 = vsel %vm4025_vm8, %v4119_v41, %v4118_v63  ;;  %v4046_v47 = vsel %vm4025_vm8, %v4045_v11, %v4044_v52 }
 0x5a7   :  { %v4154_v15 = vsel %vm4022_vm7, %v4153_v51, %v4152_v9  ;;  %v4083_v55 = vsel %vm4022_vm7, %v4082_v30, %v4081_v42  ;;  %v4138_v0 = vsel %vm4025_vm8, %v4137_v49, %v4136_v48  ;;  %v4065_v46 = vsel %vm4025_vm8, %v4064_v29, %v4063_v17 }
 0x5a8   :  { %v4155_v25 = vrot.slane %v4005_v16, 4  ;;  %v4102_v50 = vsel %vm4022_vm7, %v4101_v34, %v4100_v43  ;;  %v4084_v60 = vsel %vm4025_vm8, %v4005_v16, %v4083_v55  ;;  %v4023_v6 = vsel %vm4022_vm7, %v4021_v1, %v4020_v2 }
 0x5a9   :  { %v4104_v35 = vsel %vm4025_vm8, %v4103_v45, %v4102_v50  ;;  %v4026_v12 = vsel %vm4025_vm8, %v4024_v57, %v4023_v6 }
 0x5aa   :  { %v4156_v44 = vsel %vm4025_vm8, %v4155_v25, %v4154_v15 }
 0x5d5   :  { %v3969_v7 = vpop.permute.xlu1 %3968 }
 0x5d6   :  { %v4006_v14 = vsel %vm4001_vm5, %v3997_v39, %v3969_v7  ;;  %v3971_v59 = vpop.permute.xlu0 %3970 }
 0x5d7   :  { %v6259_v24 = vsel %vm4001_vm5, %v3998_v22, %v3971_v59  ;;  %v4121_v54 = vrot.slane %v4006_v14, 1  ;;  %v4047_v18 = vrot.slane %v4006_v14, 5  ;;  %v4139_v21 = vrot.slane %v4006_v14, 2 }
 0x5d8   :  { %v4049_v28 = vrot.slane %v6259_v24, 4  ;;  %v4141_v32 = vrot.slane %v6259_v24, 1  ;;  %v4066_v22 = vrot.slane %v4006_v14, 6  ;;  %v4068_v58 = vrot.slane %v6259_v24, 5 }
 0x5d9   :  { %v4122_v39 = vsel %vm4028_vm9, %v4121_v54, %v4120_v31  ;;  %v4048_v38 = vsel %vm4028_vm9, %v4047_v18, %v4046_v47  ;;  %v4140_v10 = vsel %vm4028_vm9, %v4139_v21, %v4138_v0  ;;  %v4027_v8 = vrot.slane %v4006_v14, 4 }
 0x5da   :  { %v4067_v53 = vsel %vm4028_vm9, %v4066_v22, %v4065_v46  ;;  %v4157_v5 = vrot.slane %v4006_v14, 3  ;;  %v4030_v61 = vrot.slane %v6259_v24, 3  ;;  %v4106_v40 = vrot.slane %v6259_v24, 7 }
 0x5db   :  { %v4123_v3 = vsel %vm4031_vm10, %v6259_v24, %v4122_v39  ;;  %v4050_v62 = vsel %vm4031_vm10, %v4049_v28, %v4048_v38  ;;  %v4142_v13 = vsel %vm4031_vm10, %v4141_v32, %v4140_v10  ;;  %v4069_v37 = vsel %vm4031_vm10, %v4068_v58, %v4067_v53 }
 0x5dc   :  { %v4159_v16 = vrot.slane %v6259_v24, 2  ;;  %v4085_v2 = vrot.slane %v4006_v14, 7  ;;  %v4158_v4 = vsel %vm4028_vm9, %v4157_v5, %v4156_v44  ;;  %v4087_v43 = vrot.slane %v6259_v24, 6 }
 0x5dd   :  { %v3973_v26 = vpop.permute.xlu0 %3972  ;;  %v4105_v33 = vsel %vm4028_vm9, %v4006_v14, %v4104_v35  ;;  %v4029_v51 = vsel %vm4028_vm9, %v4027_v8, %v4026_v12 }
 0x5de   :  { %v3975_v36 = vpop.permute.xlu1 %3974  ;;  %v4008_v23 = vsel %vm4001_vm5, %v6233_v20, %v3973_v26  ;;  %v4086_v1 = vsel %vm4028_vm9, %v4085_v2, %v4084_v60  ;;  %v4107_v45 = vsel %vm4031_vm10, %v4106_v40, %v4105_v33  ;;  %v4160_v9 = vsel %vm4031_vm10, %v4159_v16, %v4158_v4 }
 0x5df   :  { %v4009_v19 = vsel %vm4001_vm5, %v6236_v27, %v3975_v36  ;;  %v4124_v56 = vrot.slane %v4008_v23, 7  ;;  %v4051_v30 = vrot.slane %v4008_v23, 3  ;;  %v4143_v63 = vsel %vm4034_vm11, %v4008_v23, %v4142_v13 }
 0x5e0   :  { %v4126_v41 = vrot.slane %v4009_v19, 6  ;;  %v4053_v11 = vrot.slane %v4009_v19, 2  ;;  %v4070_v52 = vrot.slane %v4008_v23, 4  ;;  %v4144_v29 = vrot.slane %v4009_v19, 7 }
 0x5e1   :  { %v4125_v20 = vsel %vm4034_vm11, %v4124_v56, %v4123_v3  ;;  %v4052_v49 = vsel %vm4034_vm11, %v4051_v30, %v4050_v62  ;;  %v4072_v34 = vrot.slane %v4009_v19, 3  ;;  %v4161_v42 = vrot.slane %v4008_v23, 1 }
 0x5e2   :  { %v4127_v48 = vsel %vm4037_vm12, %v4126_v41, %v4125_v20  ;;  %v4054_v17 = vsel %vm4037_vm12, %v4053_v11, %v4052_v49  ;;  %v4071_v27 = vsel %vm4034_vm11, %v4070_v52, %v4069_v37  ;;  %v4089_v57 = vrot.slane %v4008_v23, 5 }
 0x5e3   :  { %4128 = vrot.lane.b32.xlu1 %v4127_v48, %s5096_s12  ;;  %4055 = vrot.lane.b32.xlu0 %v4054_v17, %s5096_s12  ;;  %v4110_v7 = vrot.slane %v4009_v19, 5  ;;  %v4108_v31 = vrot.slane %v4008_v23, 6  ;;  %v4032_v47 = vsel %vm4031_vm10, %v4030_v61, %v4029_v51  ;;  %v4145_v15 = vsel %vm4037_vm12, %v4144_v29, %v4143_v63 }
 0x5e4   :  { %v4073_v55 = vsel %vm4037_vm12, %v4072_v34, %v4071_v27  ;;  %v4036_v14 = vrot.slane %v4009_v19, 1  ;;  %v4033_v59 = vrot.slane %v4008_v23, 2  ;;  %v4162_v0 = vsel %vm4034_vm11, %v4161_v42, %v4160_v9 }
 0x5e5   :  { %v4088_v46 = vsel %vm4031_vm10, %v4087_v43, %v4086_v1  ;;  %v4091_v25 = vrot.slane %v4009_v19, 4  ;;  %v4109_v24 = vsel %vm4034_vm11, %v4108_v31, %v4107_v45  ;;  %v4163_v21 = vsel %vm4037_vm12, %v4009_v19, %v4162_v0 }
 0x5e6   :  { %v4090_v54 = vsel %vm4034_vm11, %v4089_v57, %v4088_v46  ;;  %v4111_v18 = vsel %vm4037_vm12, %v4110_v7, %v4109_v24  ;;  %v4035_v50 = vsel %vm4034_vm11, %v4033_v59, %v4032_v47 }
 0x5e7   :  { %4146 = vrot.lane.b32.xlu1 %v4145_v15, %s5085_s1  ;;  %4074 = vrot.lane.b32.xlu0 %v4073_v55, %s5085_s1  ;;  %4113 = vst.msk [vmem:[#allocation8 + $0x8] sm:$0xff] %vm93_vm0, %v4111_v18  ;;  %v4038_v28 = vsel %vm4037_vm12, %v4036_v14, %v4035_v50  ;;  %v4092_v60 = vsel %vm4037_vm12, %v4091_v25, %v4090_v54 }
 0x5e8   :  { %4040 = vst.msk [vmem:[#allocation8] sm:$0xff] %vm93_vm0, %v4038_v28 }
 0x5eb   :  { %4164 = vrot.lane.b32.xlu1 %v4163_v21, %s5091_s8  ;;  %4093 = vrot.lane.b32.xlu0 %v4092_v60, %s5091_s8 }
 0x655   :  { %v4129_v6 = vpop.permute.xlu1 %4128  ;;  %v4056_v39 = vpop.permute.xlu0 %4055 }
 0x656   :  { %4131 = vst.msk [vmem:[#allocation8 + $0x8] sm:$0xff] %vm4058_vm13, %v4129_v6  ;;  %4059 = vst.msk [vmem:[#allocation8] sm:$0xff] %vm4058_vm13, %v4056_v39 }
 0x659   :  { %v4147_v38 = vpop.permute.xlu1 %4146  ;;  %v4075_v32 = vpop.permute.xlu0 %4074 }
 0x65a   :  { %4149 = vst.msk [vmem:[#allocation8 + $0x8] sm:$0xff] %vm4077_vm14, %v4147_v38  ;;  %4078 = vst.msk [vmem:[#allocation8] sm:$0xff] %vm4077_vm14, %v4075_v32 }
 0x65d   :  { %v4165_v22 = vpop.permute.xlu1 %4164  ;;  %v4094_v10 = vpop.permute.xlu0 %4093 }
 0x65e   :  { %4097 = vst.msk [vmem:[#allocation8] sm:$0xff] %vm4096_vm15, %v4094_v10  ;;  %4167 = vst.msk [vmem:[#allocation8 + $0x8] sm:$0xff] %vm4096_vm15, %v4165_v22 }
 0x65f   :  { %5065 = shalt.err (!%p5062_p5)
}
 0x660   :  { %4177 = dma.vmem_to_hbm [thread:$0]  %s4175_s14, 256, %s6324_s4, [#allocation4]  }
 0x661   :  { %5078 = dma.done.wait [#allocation4], 256  }
 0x662   :  { %5079 = vsyncadd [#allocation4], 4294967040 }
 0x663   :  { %4181 = vsyncpa [#allocation3], 1 }
 0x664   :  { %4182 = vsyncpa [#allocation6], 1 }
 0x665   :  { %4183 = vsyncpa [#allocation4], 1 }

</bundles_post_ra>
